<compile_context>
chip_gen: v7x
topology: tpu7x:2x2x1
jax: 0.10.0
libtpu: 0.0.40
codegen_flags: <defaults>
</compile_context>

<pallas_src>
import math

import jax
import jax.numpy as jnp
from jax.experimental import pallas as pl
from jax.experimental.pallas import tpu as pltpu

LAYER_DIMS = [(784, 512), (512, 256), (256, 128), (128, 10)]
D_IN = LAYER_DIMS[0][0]
D_OUT = LAYER_DIMS[-1][1]
D_OUT_PAD = 128   # lane-dense output store (no masked partial stores on 10 lanes)


def _cdiv(a, b):
    return (a + b - 1) // b


def _round_up(n, m):
    return ((n + m - 1) // m) * m


def mlp_kernel(x_ref, w1_ref, b1_ref, w2_ref, b2_ref, w3_ref, b3_ref,
               w4_ref, b4_ref, o_ref):
    """One batch tile through all four layers; weights resident in VMEM."""
    # In-kernel f32 -> bf16 cast (cheap VPU work hidden under layer-1 MXU time).
    x = x_ref[...].astype(jnp.bfloat16)
    # Layer 1: 784 -> 512, ReLU. bf16 MXU operands, f32 accumulate.
    h = jnp.dot(x, w1_ref[...], preferred_element_type=jnp.float32)
    h = jnp.maximum(h + b1_ref[...], 0.0)
    # Layer 2: 512 -> 256, ReLU.
    h = jnp.dot(h.astype(jnp.bfloat16), w2_ref[...],
                preferred_element_type=jnp.float32)
    h = jnp.maximum(h + b2_ref[...], 0.0)
    # Layer 3: 256 -> 128, ReLU.
    h = jnp.dot(h.astype(jnp.bfloat16), w3_ref[...],
                preferred_element_type=jnp.float32)
    h = jnp.maximum(h + b3_ref[...], 0.0)
    # Layer 4: 128 -> 128 (pad of 10), no activation; lane-dense bf16 store.
    out = jnp.dot(h.astype(jnp.bfloat16), w4_ref[...],
                  preferred_element_type=jnp.float32) + b4_ref[...]
    o_ref[...] = out.astype(o_ref.dtype)


def init_params(key):
    """Kaiming-normal (relu) weights, zero biases — matches the PyTorch init.

    PyTorch Linear stores weight as (out, in); we keep the transposed (in, out)
    layout so the kernel computes x @ W + b.
    """
    params = []
    for i, (fan_in, fan_out) in enumerate(LAYER_DIMS):
        k = jax.random.fold_in(key, i)
        std = math.sqrt(2.0 / fan_in)  # kaiming_normal_, nonlinearity='relu'
        w = jax.random.normal(k, (fan_in, fan_out), dtype=jnp.float32) * std
        b = jnp.zeros((fan_out,), dtype=jnp.float32)
        params.append((w, b))
    return params


def prepare_params(params):
    """Cast the f32 (in, out) params into the kernel layout.

    Only the last layer is padded: W4 cols / b4 zero-padded 10 -> 128 for a
    lane-dense output store. Weights cast to bf16 (MXU operands); biases kept
    f32 with shape (1, out).
    """
    kparams = []
    n = len(params)
    for i, (w, b) in enumerate(params):
        fan_in, fan_out = w.shape
        pad_out = (D_OUT_PAD - fan_out) if i == n - 1 else 0
        w = jnp.pad(w, ((0, 0), (0, pad_out))).astype(jnp.bfloat16)
        b = jnp.pad(b.reshape(1, -1), ((0, 0), (0, pad_out))).astype(jnp.float32)
        kparams.append((w, b))
    return kparams


def mlp_forward(x, kparams, *, batch_tile=1024):
    """Fused MLP forward. `kparams` must come from prepare_params().

    x: (B, 784) float32 (or bfloat16). Returns (B, 10) float32 logits.
    """
    (w1, b1), (w2, b2), (w3, b3), (w4, b4) = kparams
    B, d_in = x.shape
    assert d_in == D_IN, f"expected {D_IN} input features, got {d_in}"

    # Tile choice: aim for >= 2 grid steps (so the "parallel" batch axis shards
    # across both TensorCores on v7x) while capping the tile at batch_tile.
    # Tile is a multiple of 16 (bf16 sublane pack for the output / casts).
    half = _round_up(max(_cdiv(B, 2), 1), 16)
    tile = max(16, min(batch_tile, half))
    grid = (_cdiv(B, tile),)   # partial last tile handled by Pallas (row-independent)

    weights = (w1, b1, w2, b2, w3, b3, w4, b4)

    out = pl.pallas_call(
        mlp_kernel,
        out_shape=jax.ShapeDtypeStruct((B, D_OUT_PAD), jnp.bfloat16),
        grid_spec=pltpu.PrefetchScalarGridSpec(
            num_scalar_prefetch=0,
            grid=grid,
            in_specs=[pl.BlockSpec((tile, D_IN), lambda i: (i, 0))]
                     + [pl.BlockSpec(a.shape, lambda i: (0, 0)) for a in weights],
            out_specs=pl.BlockSpec((tile, D_OUT_PAD), lambda i: (i, 0)),
        ),
        compiler_params=pltpu.CompilerParams(
            dimension_semantics=("parallel",),
            vmem_limit_bytes=32 * 1024 * 1024),
    )(x, *weights)

    # Tiny (B, 10) slice + f32 cast outside the kernel.
    return out[:, :D_OUT].astype(jnp.float32)


def reference_forward(x, kparams):
    """Pure-JAX reference using the same bf16-operand / f32-accumulate path."""
    h = x.astype(jnp.bfloat16)
    n = len(kparams)
    for i, (w, b) in enumerate(kparams):
        h = jnp.dot(h, w, preferred_element_type=jnp.float32) + b
        if i < n - 1:
            h = jnp.maximum(h, 0.0).astype(jnp.bfloat16)
    return h[:, :D_OUT].astype(jnp.bfloat16).astype(jnp.float32)


if __name__ == "__main__":
    key = jax.random.PRNGKey(0)
    params = init_params(jax.random.fold_in(key, 123))
    kparams = prepare_params(params)

    # Divisible batch: grid of 2 (two 16-row tiles).
    B = 32
    x = jax.random.normal(jax.random.fold_in(key, 7), (B, D_IN), dtype=jnp.float32)
    ref = reference_forward(x, kparams)
    out = jax.block_until_ready(mlp_forward(x, kparams))
    assert out.shape == (B, D_OUT)
    assert jnp.allclose(out, ref, atol=2e-2, rtol=2e-2), "mismatch (divisible grid)"

    # Non-divisible batch: cdiv grid with a partial last tile (no row padding).
    B2 = 40
    x2 = jax.random.normal(jax.random.fold_in(key, 11), (B2, D_IN), dtype=jnp.float32)
    ref2 = reference_forward(x2, kparams)
    out2 = jax.block_until_ready(mlp_forward(x2, kparams))
    assert out2.shape == (B2, D_OUT)
    assert jnp.allclose(out2, ref2, atol=2e-2, rtol=2e-2), "mismatch (partial tile)"

    print("KERNEL_OK")
</pallas_src>

<mosaic_0001>
module attributes {stable_mosaic.version = 11 : i64} {
  func.func @mlp_kernel(%arg0: i32, %arg1: memref<16x784xf32, #tpu.memory_space<vmem>>, %arg2: memref<784x512xbf16, #tpu.memory_space<vmem>>, %arg3: memref<1x512xf32, #tpu.memory_space<vmem>>, %arg4: memref<512x256xbf16, #tpu.memory_space<vmem>>, %arg5: memref<1x256xf32, #tpu.memory_space<vmem>>, %arg6: memref<256x128xbf16, #tpu.memory_space<vmem>>, %arg7: memref<1x128xf32, #tpu.memory_space<vmem>>, %arg8: memref<128x128xbf16, #tpu.memory_space<vmem>>, %arg9: memref<1x128xf32, #tpu.memory_space<vmem>>, %arg10: memref<16x128xbf16, #tpu.memory_space<vmem>>) attributes {dimension_semantics = [#tpu.dimension_semantics<parallel>], iteration_bounds = array<i64: 2>, scalar_prefetch = 0 : i64, scratch_operands = 0 : i64, tpu.core_type = #tpu.core_type<tc>, window_params = [{transform_indices = @transform_0, window_bounds = array<i64: 16, 784>}, {pipeline_mode = #tpu.pipeline_mode<synchronous>, transform_indices = @transform_1, window_bounds = array<i64: 784, 512>}, {pipeline_mode = #tpu.pipeline_mode<synchronous>, transform_indices = @transform_2, window_bounds = array<i64: 1, 512>}, {pipeline_mode = #tpu.pipeline_mode<synchronous>, transform_indices = @transform_3, window_bounds = array<i64: 512, 256>}, {pipeline_mode = #tpu.pipeline_mode<synchronous>, transform_indices = @transform_4, window_bounds = array<i64: 1, 256>}, {pipeline_mode = #tpu.pipeline_mode<synchronous>, transform_indices = @transform_5, window_bounds = array<i64: 256, 128>}, {pipeline_mode = #tpu.pipeline_mode<synchronous>, transform_indices = @transform_6, window_bounds = array<i64: 1, 128>}, {pipeline_mode = #tpu.pipeline_mode<synchronous>, transform_indices = @transform_7, window_bounds = array<i64: 128, 128>}, {pipeline_mode = #tpu.pipeline_mode<synchronous>, transform_indices = @transform_8, window_bounds = array<i64: 1, 128>}, {transform_indices = @transform_9, window_bounds = array<i64: 16, 128>}]} {
    %c0 = arith.constant 0 : index
    %c0_0 = arith.constant 0 : index
    %0 = vector.load %arg1[%c0, %c0_0] : memref<16x784xf32, #tpu.memory_space<vmem>>, vector<16x784xf32>
    %1 = arith.truncf %0 : vector<16x784xf32> to vector<16x784xbf16>
    %c0_1 = arith.constant 0 : index
    %c0_2 = arith.constant 0 : index
    %2 = vector.load %arg2[%c0_1, %c0_2] : memref<784x512xbf16, #tpu.memory_space<vmem>>, vector<784x512xbf16>
    %cst = arith.constant dense<0.000000e+00> : vector<16x512xf32>
    %3 = tpu.matmul %1, %2, %cst {dimension_numbers = #tpu.dot_dimension_numbers<[1], [0], [0], [1], [0, 0, 1, 1], [], []>} : vector<16x784xbf16>, vector<784x512xbf16>, vector<16x512xf32> -> vector<16x512xf32>
    %c0_3 = arith.constant 0 : index
    %c0_4 = arith.constant 0 : index
    %4 = vector.load %arg3[%c0_3, %c0_4] : memref<1x512xf32, #tpu.memory_space<vmem>>, vector<1x512xf32>
    %5 = vector.broadcast %4 : vector<1x512xf32> to vector<16x512xf32>
    %6 = arith.addf %3, %5 : vector<16x512xf32>
    %cst_5 = arith.constant 0.000000e+00 : f32
    %7 = vector.broadcast %cst_5 : f32 to vector<16x512xf32>
    %8 = arith.maximumf %6, %7 : vector<16x512xf32>
    %9 = arith.truncf %8 : vector<16x512xf32> to vector<16x512xbf16>
    %c0_6 = arith.constant 0 : index
    %c0_7 = arith.constant 0 : index
    %10 = vector.load %arg4[%c0_6, %c0_7] : memref<512x256xbf16, #tpu.memory_space<vmem>>, vector<512x256xbf16>
    %cst_8 = arith.constant dense<0.000000e+00> : vector<16x256xf32>
    %11 = tpu.matmul %9, %10, %cst_8 {dimension_numbers = #tpu.dot_dimension_numbers<[1], [0], [0], [1], [0, 0, 1, 1], [], []>} : vector<16x512xbf16>, vector<512x256xbf16>, vector<16x256xf32> -> vector<16x256xf32>
    %c0_9 = arith.constant 0 : index
    %c0_10 = arith.constant 0 : index
    %12 = vector.load %arg5[%c0_9, %c0_10] : memref<1x256xf32, #tpu.memory_space<vmem>>, vector<1x256xf32>
    %13 = vector.broadcast %12 : vector<1x256xf32> to vector<16x256xf32>
    %14 = arith.addf %11, %13 : vector<16x256xf32>
    %cst_11 = arith.constant 0.000000e+00 : f32
    %15 = vector.broadcast %cst_11 : f32 to vector<16x256xf32>
    %16 = arith.maximumf %14, %15 : vector<16x256xf32>
    %17 = arith.truncf %16 : vector<16x256xf32> to vector<16x256xbf16>
    %c0_12 = arith.constant 0 : index
    %c0_13 = arith.constant 0 : index
    %18 = vector.load %arg6[%c0_12, %c0_13] : memref<256x128xbf16, #tpu.memory_space<vmem>>, vector<256x128xbf16>
    %cst_14 = arith.constant dense<0.000000e+00> : vector<16x128xf32>
    %19 = tpu.matmul %17, %18, %cst_14 {dimension_numbers = #tpu.dot_dimension_numbers<[1], [0], [0], [1], [0, 0, 1, 1], [], []>} : vector<16x256xbf16>, vector<256x128xbf16>, vector<16x128xf32> -> vector<16x128xf32>
    %c0_15 = arith.constant 0 : index
    %c0_16 = arith.constant 0 : index
    %20 = vector.load %arg7[%c0_15, %c0_16] : memref<1x128xf32, #tpu.memory_space<vmem>>, vector<1x128xf32>
    %21 = vector.broadcast %20 : vector<1x128xf32> to vector<16x128xf32>
    %22 = arith.addf %19, %21 : vector<16x128xf32>
    %cst_17 = arith.constant 0.000000e+00 : f32
    %23 = vector.broadcast %cst_17 : f32 to vector<16x128xf32>
    %24 = arith.maximumf %22, %23 : vector<16x128xf32>
    %25 = arith.truncf %24 : vector<16x128xf32> to vector<16x128xbf16>
    %c0_18 = arith.constant 0 : index
    %c0_19 = arith.constant 0 : index
    %26 = vector.load %arg8[%c0_18, %c0_19] : memref<128x128xbf16, #tpu.memory_space<vmem>>, vector<128x128xbf16>
    %cst_20 = arith.constant dense<0.000000e+00> : vector<16x128xf32>
    %27 = tpu.matmul %25, %26, %cst_20 {dimension_numbers = #tpu.dot_dimension_numbers<[1], [0], [0], [1], [0, 0, 1, 1], [], []>} : vector<16x128xbf16>, vector<128x128xbf16>, vector<16x128xf32> -> vector<16x128xf32>
    %c0_21 = arith.constant 0 : index
    %c0_22 = arith.constant 0 : index
    %28 = vector.load %arg9[%c0_21, %c0_22] : memref<1x128xf32, #tpu.memory_space<vmem>>, vector<1x128xf32>
    %29 = vector.broadcast %28 : vector<1x128xf32> to vector<16x128xf32>
    %30 = arith.addf %27, %29 : vector<16x128xf32>
    %31 = arith.truncf %30 : vector<16x128xf32> to vector<16x128xbf16>
    %c0_23 = arith.constant 0 : index
    %c0_24 = arith.constant 0 : index
    %32 = vector.load %arg10[%c0_23, %c0_24] : memref<16x128xbf16, #tpu.memory_space<vmem>>, vector<16x128xbf16>
    tpu.vector_store %arg10[%c0_23, %c0_24], %31 {strides = array<i32>} : memref<16x128xbf16, #tpu.memory_space<vmem>>, vector<16x128xbf16>,
    return
  }
  func.func @transform_0(%arg0: i32) -> (i32, i32) {
    %c0_i32 = arith.constant 0 : i32
    %c0_i32_0 = arith.constant 0 : i32
    return %arg0, %c0_i32 : i32, i32
  }
  func.func @transform_1(%arg0: i32) -> (i32, i32) {
    %c0_i32 = arith.constant 0 : i32
    %c0_i32_0 = arith.constant 0 : i32
    %c0_i32_1 = arith.constant 0 : i32
    return %c0_i32, %c0_i32_0 : i32, i32
  }
  func.func @transform_2(%arg0: i32) -> (i32, i32) {
    %c0_i32 = arith.constant 0 : i32
    %c0_i32_0 = arith.constant 0 : i32
    %c0_i32_1 = arith.constant 0 : i32
    return %c0_i32, %c0_i32_0 : i32, i32
  }
  func.func @transform_3(%arg0: i32) -> (i32, i32) {
    %c0_i32 = arith.constant 0 : i32
    %c0_i32_0 = arith.constant 0 : i32
    %c0_i32_1 = arith.constant 0 : i32
    return %c0_i32, %c0_i32_0 : i32, i32
  }
  func.func @transform_4(%arg0: i32) -> (i32, i32) {
    %c0_i32 = arith.constant 0 : i32
    %c0_i32_0 = arith.constant 0 : i32
    %c0_i32_1 = arith.constant 0 : i32
    return %c0_i32, %c0_i32_0 : i32, i32
  }
  func.func @transform_5(%arg0: i32) -> (i32, i32) {
    %c0_i32 = arith.constant 0 : i32
    %c0_i32_0 = arith.constant 0 : i32
    %c0_i32_1 = arith.constant 0 : i32
    return %c0_i32, %c0_i32_0 : i32, i32
  }
  func.func @transform_6(%arg0: i32) -> (i32, i32) {
    %c0_i32 = arith.constant 0 : i32
    %c0_i32_0 = arith.constant 0 : i32
    %c0_i32_1 = arith.constant 0 : i32
    return %c0_i32, %c0_i32_0 : i32, i32
  }
  func.func @transform_7(%arg0: i32) -> (i32, i32) {
    %c0_i32 = arith.constant 0 : i32
    %c0_i32_0 = arith.constant 0 : i32
    %c0_i32_1 = arith.constant 0 : i32
    return %c0_i32, %c0_i32_0 : i32, i32
  }
  func.func @transform_8(%arg0: i32) -> (i32, i32) {
    %c0_i32 = arith.constant 0 : i32
    %c0_i32_0 = arith.constant 0 : i32
    %c0_i32_1 = arith.constant 0 : i32
    return %c0_i32, %c0_i32_0 : i32, i32
  }
  func.func @transform_9(%arg0: i32) -> (i32, i32) {
    %c0_i32 = arith.constant 0 : i32
    %c0_i32_0 = arith.constant 0 : i32
    return %arg0, %c0_i32 : i32, i32
  }
}

</mosaic_0001>

<bundles_post_ra>
// kernel: tpu_custom_call.1
= control target key start
LH: loop header
LB: loop body
LE: loop exit
PB: predicated region body
PF: predicated region fallthrough
CT: control target
= control target key end

     0   :  { %s4463_s0 = inlined_call_operand.hbm [shape: f32[32,784], index: 0, kind: input, shape index: {}]   ;;  %s4464_s1 = inlined_call_operand.hbm [shape: bf16[784,512], index: 1, kind: input, shape index: {}]   ;;  %s4465_s2 = inlined_call_operand.vmem [shape: f32[1,512], index: 2, kind: input, shape index: {}]   ;;  %s4466_s3 = inlined_call_operand.hbm [shape: bf16[512,256], index: 3, kind: input, shape index: {}]   ;;  %s4467_s4 = inlined_call_operand.vmem [shape: f32[1,256], index: 4, kind: input, shape index: {}]   ;;  %s4468_s5 = inlined_call_operand.hbm [shape: bf16[256,128], index: 5, kind: input, shape index: {}]   ;;  %s4469_s6 = inlined_call_operand.vmem [shape: f32[1,128], index: 6, kind: input, shape index: {}]   ;;  %s4470_s7 = inlined_call_operand.hbm [shape: bf16[128,128], index: 7, kind: input, shape index: {}]   ;;  %s4471_s8 = inlined_call_operand.vmem [shape: f32[1,128], index: 8, kind: input, shape index: {}]   ;;  %s4472_s9 = inlined_call_operand.hbm [shape: bf16[32,128], index: 9, kind: output, shape index: {}]  }
   0x1   :  { %4480 = sst [smem:[#allocation18_spill]] %s4464_s1 }
   0x2   :  { %14 = vsyncpa [#allocation3], 0 }
   0x3   :  { %16 = vsyncpa [#allocation3 + $0x1], 0 }
   0x4   :  { %17 = vsyncpa [#allocation6], 0 }
   0x5   :  { %18 = vsyncpa [#allocation9], 0 }
   0x6   :  { %19 = vsyncpa [#allocation4], 0 }
   0x7   :  { %21 = vsyncpa [#allocation4 + $0x1], 0  ;;  %s4120_s30 = smov 0   ;;  %s4122_s10 = smov 0  }
   0x8   :  { %s4124_s11 = smov 0   ;;  %s4126_s12 = smov 0  }
   0x9 LB: > { %4481 = sst [smem:[#allocation16_spill]] %s4037_s30  ;;  %s4141_s13 = sadd.s32 4294967295, %s4049_s12   ;;  %s4049_s12 = sphi %s4126_s12, %s4507_s12   ;;  %s4045_s11 = sphi %s4124_s11, %s4506_s11   ;;  %s4041_s10 = sphi %s4122_s10, %s4505_s10   ;;  %s4037_s30 = sphi %s4120_s30, %s4504_s30  }
   0xa   : > { %s2906_s14 = sadd.s32 4294967294, %s4049_s12   ;;  %p47_p0 = scmp.ne.s32.totalorder %s4041_s10, %s4037_s30 }
   0xb   : > { %p4473_p1 = scmp.eq.s32.totalorder %s4141_s13, 0  ;;  %p245_p3 = scmp.eq.s32.totalorder %s2906_s14, 1 }
   0xc   : > { %p2907_p5 = scmp.ge.s32.totalorder %s4049_s12, 1  ;;  %p252_p7 = scmp.lt.s32.totalorder %s4049_s12, 3 }
   0xd   : > { %p4150_p4 = por %p4473_p1, %p47_p0  ;;  %p4155_p6 = por %p245_p3, %p47_p0 }
   0xe   : > { %p4160_p8 = pnand %p2907_p5, %p252_p7  ;;  %s4051_s18 = smov [#allocation5]  }
   0xf   : > { %s4482_s15 = scalar_select %p4150_p4, 1, 0 }
  0x10   : > { %s4483_s16 = scalar_select %p4155_p6, 1, 0 }
  0x11   : > { %s4485_s17 = scalar_select %p4160_p8, 1, 0 }
  0x12   : > { %4484 = sst [smem:[#allocation17_spill]] %s4483_s16  ;;  %s264_s19 = sshll.u32 %s4051_s18, 4  ;;  %s4164_s19 = int_to_ptr.vmem [resolvable:$true] %s264_s19 }
  0x13   : > { %p3339_p9 = pneg %p4160_p8  ;;  %s4052_s21 = smov [#allocation8]  }
  0x14   : > { %s296_s22 = sshll.u32 %s4052_s21, 4  ;;  %s4487_s1 = sld [smem:[#allocation18_spill]]  ;;  %s4175_s22 = int_to_ptr.vmem [resolvable:$true] %s296_s22 }
  0x15   : > { %p4171_p11 = pnand %p3339_p9, %p4473_p1 }
  0x17   : > { %p4185_p13 = pneg %p4171_p11 }
  0x1a   : > { %s3833_s25 = scalar_lea.hbm %s4487_s1, 25088 }
  0x1b   : > { %p3834_p12 = scmp.ne.s32.totalorder %s4487_s1, %s3833_s25  ;;  %p3840_p5 = scmp.lt.u32.totalorder %s3833_s25, %s4487_s1 }
  0x1d   : > { %p3836_p0 = pnand %p4185_p13, %p3834_p12 }
  0x1f   : > { %p3837_p3 = pneg %p3836_p0 }
  0x21   : > { %p3842_p7 = pnand %p3840_p5, %p3837_p3 }
  0x23   : > { %3845 = shalt.err (!%p3842_p7)
}
  0x24   : > { %s3846_s18 = scalar_lea.vmem %s4164_s19, 25088  ;;  %p3854_p2 = scmp.lt.s32.totalorder %s4164_s19, %s4164_s19 }
  0x25   : > { %p3847_p9 = scmp.ne.s32.totalorder %s4164_s19, %s3846_s18  ;;  %p3855_p6 = scmp.lt.s32.totalorder %s3846_s18, %s3846_s18 }
  0x27   : > { %p3849_p10 = pnand %p3847_p9, %p4185_p13  ;;  %p3856_p12 = por %p3855_p6, %p3854_p2 }
  0x29   : > { %p3850_p1 = pneg %p3849_p10 }
  0x2b   : > { %p3857_p0 = pnand %p3856_p12, %p3850_p1 }
  0x2d   : > { %3860 = shalt.err (!%p3857_p0)
}
  0x2e   : > { %s4053_s21 = smov 256   ;;  %s4054_s23 = smov 16  }
  0x2f   : > { %3342 = dma.hbm_to_vmem [thread:$0]  (!%p4171_p11), %s4487_s1, 25088, %s4164_s19, [#allocation6], %s4053_s21, %s4053_s21, %s4054_s23  }
  0x30   : > { %s3861_s29 = scalar_lea.hbm %s4468_s5, 2048 }
  0x31   : > { %p3862_p2 = scmp.ne.s32.totalorder %s4468_s5, %s3861_s29  ;;  %p3868_p10 = scmp.lt.u32.totalorder %s3861_s29, %s4468_s5 }
  0x33   : > { %p3864_p1 = pnand %p3862_p2, %p4185_p13 }
  0x35   : > { %p3865_p6 = pneg %p3864_p1 }
  0x37   : > { %p3870_p3 = pnand %p3868_p10, %p3865_p6 }
  0x39   : > { %3873 = shalt.err (!%p3870_p3)
}
  0x3a   : > { %s3874_s19 = scalar_lea.vmem %s4175_s22, 2048  ;;  %p3882_p12 = scmp.lt.s32.totalorder %s4175_s22, %s4175_s22 }
  0x3b   : > { %p3875_p5 = scmp.ne.s32.totalorder %s4175_s22, %s3874_s19  ;;  %p3883_p0 = scmp.lt.s32.totalorder %s3874_s19, %s3874_s19 }
  0x3d   : > { %p3877_p7 = pnand %p3875_p5, %p4185_p13  ;;  %p3884_p2 = por %p3883_p0, %p3882_p12 }
  0x3f   : > { %p3878_p9 = pneg %p3877_p7 }
  0x41   : > { %p3885_p1 = pnand %p3884_p2, %p3878_p9 }
  0x43   : > { %3888 = shalt.err (!%p3885_p1)
}
  0x44   : > { %s4478_s16 = smov 64   ;;  %s4479_s30 = smov 4  }
  0x45   : > { %3348 = dma.hbm_to_vmem [thread:$0]  (!%p4171_p11), %s4468_s5, 2048, %s4175_s22, [#allocation9], %s4478_s16, %s4478_s16, %s4479_s30  }
  0x46   : > { %s4057_s24 = smov [#allocation7]   ;;  %s3889_s29 = scalar_lea.hbm %s4466_s3, 8192 }
  0x47   : > { %s280_s25 = sshll.u32 %s4057_s24, 4  ;;  %p3890_p6 = scmp.ne.s32.totalorder %s4466_s3, %s3889_s29  ;;  %s281_s25 = int_to_ptr.vmem [resolvable:$true] %s280_s25 }
  0x48   : > { %p3896_p5 = scmp.lt.u32.totalorder %s3889_s29, %s4466_s3 }
  0x49   : > { %p3892_p10 = pnand %p3890_p6, %p4185_p13 }
  0x4b   : > { %p3893_p3 = pneg %p3892_p10 }
  0x4d   : > { %p3898_p7 = pnand %p3896_p5, %p3893_p3 }
  0x4f   : > { %3901 = shalt.err (!%p3898_p7)
}
  0x50   : > { %s3902_s22 = scalar_lea.vmem %s281_s25, 8192  ;;  %p3910_p2 = scmp.lt.s32.totalorder %s281_s25, %s281_s25 }
  0x51   : > { %p3903_p9 = scmp.ne.s32.totalorder %s281_s25, %s3902_s22  ;;  %p3911_p1 = scmp.lt.s32.totalorder %s3902_s22, %s3902_s22 }
  0x53   : > { %p3905_p12 = pnand %p3903_p9, %p4185_p13  ;;  %p3912_p4 = por %p3911_p1, %p3910_p2 }
  0x55   : > { %p3906_p0 = pneg %p3905_p12 }
  0x57   : > { %p3913_p8 = pnand %p3912_p4, %p3906_p0 }
  0x59   : > { %3916 = shalt.err (!%p3913_p8)
}
  0x5a   : > { %s4058_s21 = smov 128   ;;  %s4059_s23 = smov 8  }
  0x5b   : > { %3345 = dma.hbm_to_vmem [thread:$0]  (!%p4171_p11), %s4466_s3, 8192, %s281_s25, [#allocation6], %s4058_s21, %s4058_s21, %s4059_s23  }
  0x5c   : > { %s4060_s26 = smov [#allocation10]   ;;  %s3917_s18 = scalar_lea.hbm %s4470_s7, 1024 }
  0x5d   : > { %s312_s27 = sshll.u32 %s4060_s26, 4  ;;  %p3918_p4 = scmp.ne.s32.totalorder %s4470_s7, %s3917_s18  ;;  %s313_s27 = int_to_ptr.vmem [resolvable:$true] %s312_s27 }
  0x5e   : > { %p3924_p10 = scmp.lt.u32.totalorder %s3917_s18, %s4470_s7 }
  0x5f   : > { %p3920_p8 = pnand %p3918_p4, %p4185_p13 }
  0x61   : > { %p3921_p6 = pneg %p3920_p8 }
  0x63   : > { %p3926_p3 = pnand %p3924_p10, %p3921_p6 }
  0x65   : > { %3929 = shalt.err (!%p3926_p3)
}
  0x66   : > { %s3930_s25 = scalar_lea.vmem %s313_s27, 1024  ;;  %p3938_p12 = scmp.lt.s32.totalorder %s313_s27, %s313_s27 }
  0x67   : > { %p3931_p5 = scmp.ne.s32.totalorder %s313_s27, %s3930_s25  ;;  %p3939_p0 = scmp.lt.s32.totalorder %s3930_s25, %s3930_s25 }
  0x69   : > { %p3933_p7 = pnand %p3931_p5, %p4185_p13  ;;  %p3940_p2 = por %p3939_p0, %p3938_p12 }
  0x6b   : > { %p3934_p9 = pneg %p3933_p7 }
  0x6d   : > { %p3941_p1 = pnand %p3940_p2, %p3934_p9 }
  0x6f   : > { %3944 = shalt.err (!%p3941_p1)
}
  0x70   : > { %s4489_s21 = smov 4   ;;  %s4490_s23 = smov 64  }
  0x71   : > { %3351 = dma.hbm_to_vmem [thread:$0]  (!%p4171_p11), %s4470_s7, 1024, %s313_s27, [#allocation9], %s4490_s23, %s4490_s23, %s4489_s21  }
  0x72   : > { %s4272_s28 = sadd.s32 1, %s4049_s12   ;;  %s34_s20 = sadd.s32 1, %s4045_s11 }
  0x73   : > { %s31_s1 = ssub.s32 %s4049_s12, %s4272_s28  ;;  %p41_p13 = scmp.ne.s32.totalorder %s4045_s11, %s4041_s10 }
  0x74   : > { %p32_p4 = scmp.eq.s32.totalorder %s31_s1, 0  ;;  %p42_p8 = scmp.eq.s32.totalorder %s4049_s12, 0 }
  0x75   : > { %p4491_p6 = scmp.eq.s32.totalorder %s4141_s13, 1  ;;  %p3364_p3 = scmp.lt.s32.totalorder %s4049_s12, 2 }
  0x76   : > { %s4288_s26 = scalar_select %p32_p4, %s4045_s11, %s34_s20  }
  0x77   : > { %p4282_p10 = por %p4491_p6, %p41_p13  ;;  %p43_p5 = por %p42_p8, %p41_p13 }
  0x78   : > { %s329_s29 = sand.u32 1, %s4045_s11   ;;  %s3317_s27 = smul.u32 1792, %s4049_s12 }
  0x79   : > { %s3316_s14 = smul.u32 112, %s329_s29  ;;  %p4292_p11 = pnand %p3364_p3, %p43_p5 }
  0x7a   : > { %s4299_s25 = scalar_lea.hbm %s4463_s0, %s3317_s27  ;;  %s4303_s16 = scalar_lea.sflag [#allocation3], %s329_s29 }
  0x7b   : > { %s333_s21 = scalar_lea.vmem [#allocation2], %s3316_s14  ;;  %s3945_s30 = scalar_lea.hbm %s4299_s25, 1792 }
  0x7c   : > { %s341_s23 = sshll.u32 %s333_s21, 4  ;;  %p3946_p7 = scmp.ne.s32.totalorder %s4299_s25, %s3945_s30  ;;  %s4301_s23 = int_to_ptr.vmem [resolvable:$true] %s341_s23 }
  0x7d   : > { %p3947_p9 = pneg %p4292_p11  ;;  %s3950_s27 = scalar_lea.hbm %s4463_s0, 3584 }
  0x7e   : > { %p3951_p2 = scmp.lt.u32.totalorder %s4299_s25, %s4463_s0  ;;  %p3952_p1 = scmp.lt.u32.totalorder %s3950_s27, %s3945_s30 }
  0x7f   : > { %p3948_p12 = pnand %p3947_p9, %p3946_p7  ;;  %p3954_p4 = scmp.lt.u32.totalorder %s3945_s30, %s4299_s25 }
  0x80   : > { %p3953_p13 = por %p3952_p1, %p3951_p2 }
  0x81   : > { %p3949_p0 = pneg %p3948_p12 }
  0x82   : > { %p3955_p8 = por %p3954_p4, %p3953_p13 }
  0x84   : > { %p3956_p6 = pnand %p3955_p8, %p3949_p0 }
  0x86   : > { %3959 = shalt.err (!%p3956_p6)
}
  0x87   : > { %s3960_s29 = scalar_lea.vmem %s4301_s23, 1792  ;;  %s4061_s14 = smov [#allocation2]  }
  0x88   : > { %p3961_p3 = scmp.ne.s32.totalorder %s4301_s23, %s3960_s29  ;;  %s3965_s21 = sshll.u32 %s4061_s14, 4  ;;  %s3966_s21 = int_to_ptr.vmem [resolvable:$false] %s3965_s21 }
  0x89   : > { %s3967_s20 = scalar_lea.vmem %s3966_s21, 3584  ;;  %p3968_p12 = scmp.lt.s32.totalorder %s4301_s23, %s3966_s21 }
  0x8a   : > { %p3963_p5 = pnand %p3961_p3, %p3947_p9  ;;  %p3969_p2 = scmp.lt.s32.totalorder %s3967_s20, %s3960_s29 }
  0x8c   : > { %p3964_p7 = pneg %p3963_p5  ;;  %p3970_p1 = por %p3969_p2, %p3968_p12 }
  0x8e   : > { %p3971_p13 = pnand %p3970_p1, %p3964_p7 }
  0x90   : > { %3974 = shalt.err (!%p3971_p13)
}
  0x91   : > { %s4062_s30 = smov 896   ;;  %s4063_s1 = smov 56  }
  0x92   : > { %3355 = dma.hbm_to_vmem [thread:$0]  (!%p4292_p11), %s4299_s25, 1792, %s4301_s23, %s4303_s16, %s4062_s30, %s4062_s30, %s4063_s1  }
  0x93   : > { %p4494_p9 = scmp.ne.s32.totalorder %s4485_s17, 0 }
  0x94   : > { %s4334_s27 = sand.u32 (!%p4494_p9), 1, %s4041_s10   ;;  %p4495_p0 = scmp.ne.s32.totalorder (!%p4494_p9), %s4482_s15, 0 }
  0x95   : > { %353 = sbr.rel (%p4494_p9) target bundleno = 1323 (0x52b), region = 56  ;;  %s356_s22 = scalar_lea.sflag (!%p4494_p9), [#allocation3], %s4334_s27 }
  0x96   : > { %s3318_s19 = smul.u32 (!%p4494_p9), 112, %s4334_s27 }
  0x98   : > { %s4338_s29 = scalar_lea.vmem (!%p4494_p9), [#allocation2], %s3318_s19 }
  0x9c   : > { %4020 = dma.done.wait (%p4495_p0), %s356_s22, 1792  }
  0x9d   : > { %4022 = vsyncadd (%p4495_p0), %s356_s22, 4294965504  ;;  %p4496_p11 = scmp.eq.s32.totalorder %s4141_s13, 0 }
  0x9f   : > { %4024 = dma.done.wait (%p4496_p11), [#allocation6], 33280   ;;  %p4497_p4 = pmov %p4496_p11 }
  0xa1   : > { %4026 = vsyncadd (%p4497_p4), [#allocation6], 4294934016  ;;  %p4498_p8 = pmov %p4497_p4 }
  0xa2   : > { %p4499_p6 = pmov %p4497_p4 }
  0xa3   : > { %4028 = dma.done.wait (%p4498_p8), [#allocation9], 3072  }
  0xa4   : > { %4030 = vsyncadd (%p4499_p6), [#allocation9], 4294964224  ;;  %v4064_v0 = vmov 0   ;;  %v3419_v1 = vld [vmem:[#allocation5 + $0x4] ss:$16 sps:$4 sm:$0xff]   ;;  %v426_v10 = vld [vmem:[%s4338_s29 + $0x68] sm:$0xff] }
  0xa5   : > { %1797 = vmatprep.mubr.bf16.mxu1 %v4064_v0  ;;  %v3421_v2 = vld [vmem:[#allocation5 + $0x604] ss:$16 sps:$4 sm:$0xff]   ;;  %1636 = vmatprep.subr.bf16.mxu0 %v3419_v1  ;;  %v3423_v3 = vld [vmem:[#allocation5] ss:$16 sps:$4 sm:$0xff]   ;;  %v3427_v6 = vld [vmem:[#allocation5 + $0x8] ss:$16 sps:$4 sm:$0xff]  }
  0xa6   : > { %v3424_v4 = vld [vmem:[#allocation5 + $0x600] ss:$16 sps:$4 sm:$0xff]   ;;  %1765 = vmatprep.subr.bf16.mxu1 %v3421_v2  ;;  %v3425_v5 = vld [vmem:[#allocation5 + $0x24] ss:$16 sps:$4 sm:$0xff]   ;;  %1637 = vmatpush1.bf16.msra.mxu0 %v3423_v3  ;;  %v3429_v7 = vld [vmem:[#allocation5 + $0xc] ss:$16 sps:$4 sm:$0xff]  }
  0xa7   : > { %1766 = vmatpush1.bf16.msra.mxu1 %v3424_v4  ;;  %1638 = vmatprep.subr.bf16.mxu0 %v3425_v5  ;;  %v3430_v8 = vld [vmem:[#allocation5 + $0x20] ss:$16 sps:$4 sm:$0xff]   ;;  %vm1632_vm0 = vcmask 130048   ;;  %v3431_v12 = vld [vmem:[#allocation5 + $0x44] ss:$16 sps:$4 sm:$0xff]   ;;  %v414_v51 = vld [vmem:[%s4338_s29 + $0x8] sm:$0xff] }
  0xa8   : > { %v419_v9 = vld [vmem:[%s4338_s29 + $0x30] sm:$0xff]  ;;  %1808 = vmatprep.subr.bf16.mxu1 %v3429_v7  ;;  %v3433_v13 = vld [vmem:[#allocation5 + $0x28] ss:$16 sps:$4 sm:$0xff]   ;;  %v3435_v14 = vld [vmem:[#allocation5 + $0x2c] ss:$16 sps:$4 sm:$0xff]   ;;  %vm4066_vm1 = vmmov 0  }
  0xa9   : > { %v4355_v11 = vpack.c.bf16 %v426_v10, %v419_v9  ;;  %v3436_v15 = vld [vmem:[#allocation5 + $0x40] ss:$16 sps:$4 sm:$0xff]   ;;  %v3437_v16 = vld [vmem:[#allocation5 + $0x64] ss:$16 sps:$4 sm:$0xff]   ;;  %v3441_v17 = vld [vmem:[#allocation5 + $0x4c] ss:$16 sps:$4 sm:$0xff]  }
  0xaa   : > { %1639 = vmatpush1.bf16.msra.mxu0 %v3430_v8  ;;  %v3442_v18 = vld [vmem:[#allocation5 + $0x60] ss:$16 sps:$4 sm:$0xff]   ;;  %v3439_v19 = vld [vmem:[#allocation5 + $0x48] ss:$16 sps:$4 sm:$0xff]   ;;  %v3443_v20 = vld [vmem:[#allocation5 + $0x84] ss:$16 sps:$4 sm:$0xff]  }
  0xab   : > { %3118 = vmatmul.mubr.msk.bf16.vlgmr.msra.gmra.mrb[0].mxu1 %vm1632_vm0, %v4355_v11  ;;  %1640 = vmatprep.subr.bf16.mxu0 %v3431_v12  ;;  %v3447_v21 = vld [vmem:[#allocation5 + $0x6c] ss:$16 sps:$4 sm:$0xff]   ;;  %v3445_v22 = vld [vmem:[#allocation5 + $0x68] ss:$16 sps:$4 sm:$0xff]   ;;  %v3448_v23 = vld [vmem:[#allocation5 + $0x80] ss:$16 sps:$4 sm:$0xff]  }
  0xac   : > { %1809 = vmatpush1.bf16.msra.mxu1 %v3427_v6  ;;  %v3449_v24 = vld [vmem:[#allocation5 + $0xa4] ss:$16 sps:$4 sm:$0xff]   ;;  %v3453_v25 = vld [vmem:[#allocation5 + $0x8c] ss:$16 sps:$4 sm:$0xff]   ;;  %v3454_v26 = vld [vmem:[#allocation5 + $0xa0] ss:$16 sps:$4 sm:$0xff]  }
  0xad   : > { %1810 = vmatprep.subr.bf16.mxu1 %v3435_v14  ;;  %v3451_v27 = vld [vmem:[#allocation5 + $0x88] ss:$16 sps:$4 sm:$0xff]   ;;  %v3455_v28 = vld [vmem:[#allocation5 + $0xc4] ss:$16 sps:$4 sm:$0xff]   ;;  %v3459_v29 = vld [vmem:[#allocation5 + $0xac] ss:$16 sps:$4 sm:$0xff]  }
  0xae   : > { %1641 = vmatpush1.bf16.msra.mxu0 %v3436_v15  ;;  %v3457_v30 = vld [vmem:[#allocation5 + $0xa8] ss:$16 sps:$4 sm:$0xff]   ;;  %v3460_v31 = vld [vmem:[#allocation5 + $0xc0] ss:$16 sps:$4 sm:$0xff]   ;;  %v3461_v32 = vld [vmem:[#allocation5 + $0xe4] ss:$16 sps:$4 sm:$0xff]  }
  0xaf   : > { %1642 = vmatprep.subr.bf16.mxu0 %v3437_v16  ;;  %v3465_v33 = vld [vmem:[#allocation5 + $0xcc] ss:$16 sps:$4 sm:$0xff]   ;;  %v3466_v34 = vld [vmem:[#allocation5 + $0xe0] ss:$16 sps:$4 sm:$0xff]   ;;  %v3463_v35 = vld [vmem:[#allocation5 + $0xc8] ss:$16 sps:$4 sm:$0xff]  }
  0xb0   : > { %1811 = vmatpush1.bf16.msra.mxu1 %v3433_v13  ;;  %v3467_v36 = vld [vmem:[#allocation5 + $0x104] ss:$16 sps:$4 sm:$0xff]   ;;  %v3471_v37 = vld [vmem:[#allocation5 + $0xec] ss:$16 sps:$4 sm:$0xff]   ;;  %v3469_v38 = vld [vmem:[#allocation5 + $0xe8] ss:$16 sps:$4 sm:$0xff]  }
  0xb1   : > { %1812 = vmatprep.subr.bf16.mxu1 %v3441_v17  ;;  %v3472_v39 = vld [vmem:[#allocation5 + $0x100] ss:$16 sps:$4 sm:$0xff]   ;;  %v3473_v40 = vld [vmem:[#allocation5 + $0x124] ss:$16 sps:$4 sm:$0xff]   ;;  %v3477_v41 = vld [vmem:[#allocation5 + $0x10c] ss:$16 sps:$4 sm:$0xff]  }
  0xb2   : > { %1643 = vmatpush1.bf16.msra.mxu0 %v3442_v18  ;;  %v3478_v42 = vld [vmem:[#allocation5 + $0x120] ss:$16 sps:$4 sm:$0xff]   ;;  %v3475_v43 = vld [vmem:[#allocation5 + $0x108] ss:$16 sps:$4 sm:$0xff]   ;;  %v3479_v44 = vld [vmem:[#allocation5 + $0x144] ss:$16 sps:$4 sm:$0xff]  }
  0xb3   : > { %1644 = vmatprep.subr.bf16.mxu0 %v3443_v20  ;;  %v3483_v45 = vld [vmem:[#allocation5 + $0x12c] ss:$16 sps:$4 sm:$0xff]   ;;  %v3481_v46 = vld [vmem:[#allocation5 + $0x128] ss:$16 sps:$4 sm:$0xff]   ;;  %v3484_v47 = vld [vmem:[#allocation5 + $0x140] ss:$16 sps:$4 sm:$0xff]  }
  0xb4   : > { %1813 = vmatpush1.bf16.msra.mxu1 %v3439_v19  ;;  %v3485_v48 = vld [vmem:[#allocation5 + $0x164] ss:$16 sps:$4 sm:$0xff]   ;;  %v3489_v49 = vld [vmem:[#allocation5 + $0x14c] ss:$16 sps:$4 sm:$0xff]   ;;  %v3487_v50 = vld [vmem:[#allocation5 + $0x148] ss:$16 sps:$4 sm:$0xff]  }
  0xb5   : > { %1814 = vmatprep.subr.bf16.mxu1 %v3447_v21  ;;  %v421_v52 = vld [vmem:[%s4338_s29 + $0x40] sm:$0xff]  ;;  %v3495_v56 = vld [vmem:[#allocation5 + $0x16c] ss:$16 sps:$4 sm:$0xff]   ;;  %v3493_v58 = vld [vmem:[#allocation5 + $0x168] ss:$16 sps:$4 sm:$0xff]   ;;  %s2921_s14 = sshll.u32 %s4334_s27, 3 }
  0xb6   : > { %1645 = vmatpush1.bf16.msra.mxu0 %v3448_v23  ;;  %v3490_v53 = vld [vmem:[#allocation5 + $0x160] ss:$16 sps:$4 sm:$0xff]   ;;  %v428_v54 = vpack.c.bf16 %v421_v52, %v414_v51  ;;  %v3491_v55 = vld [vmem:[#allocation5 + $0x184] ss:$16 sps:$4 sm:$0xff]   ;;  %v3501_v60 = vld [vmem:[#allocation5 + $0x18c] ss:$16 sps:$4 sm:$0xff]  }
  0xb7   : > { %1646 = vmatprep.subr.bf16.mxu0 %v3449_v24  ;;  %v3496_v57 = vld [vmem:[#allocation5 + $0x180] ss:$16 sps:$4 sm:$0xff]   ;;  %v3497_v59 = vld [vmem:[#allocation5 + $0x1a4] ss:$16 sps:$4 sm:$0xff]   ;;  %v3499_v62 = vld [vmem:[#allocation5 + $0x188] ss:$16 sps:$4 sm:$0xff]  }
  0xb8   : > { %1815 = vmatpush1.bf16.msra.mxu1 %v3445_v22  ;;  %1668 = vmatprep.mubr.bf16.mxu0 %v428_v54  ;;  %v3502_v61 = vld [vmem:[#allocation5 + $0x1a0] ss:$16 sps:$4 sm:$0xff]   ;;  %v3503_v63 = vld [vmem:[#allocation5 + $0x1c4] ss:$16 sps:$4 sm:$0xff]   ;;  %v3507_v1 = vld [vmem:[#allocation5 + $0x1ac] ss:$16 sps:$4 sm:$0xff]  }
  0xb9   : > { %1816 = vmatprep.subr.bf16.mxu1 %v3453_v25  ;;  %1840 = vmatprep.mubr.bf16.mxu1 %v428_v54  ;;  %v3508_v2 = vld [vmem:[#allocation5 + $0x1c0] ss:$16 sps:$4 sm:$0xff]   ;;  %v3505_v3 = vld [vmem:[#allocation5 + $0x1a8] ss:$16 sps:$4 sm:$0xff]   ;;  %v3509_v4 = vld [vmem:[#allocation5 + $0x1e4] ss:$16 sps:$4 sm:$0xff]  }
  0xba   : > { %1647 = vmatpush1.bf16.msra.mxu0 %v3454_v26  ;;  %v3513_v5 = vld [vmem:[#allocation5 + $0x1cc] ss:$16 sps:$4 sm:$0xff]   ;;  %v3514_v6 = vld [vmem:[#allocation5 + $0x1e0] ss:$16 sps:$4 sm:$0xff]   ;;  %v3511_v9 = vld [vmem:[#allocation5 + $0x1c8] ss:$16 sps:$4 sm:$0xff]  }
  0xbb   : > { %1648 = vmatprep.subr.bf16.mxu0 %v3455_v28  ;;  %v413_v7 = vld [vmem:[%s4338_s29] sm:$0xff]  ;;  %v420_v8 = vld [vmem:[%s4338_s29 + $0x38] sm:$0xff]  ;;  %s409_s30 = scalar_lea.vmem [#allocation11], %s2921_s14  ;;  %s3219_s19 = sshll.u32 %s4141_s13, 7 }
  0xbc   : > { %1817 = vmatpush1.bf16.msra.mxu1 %v3451_v27  ;;  %v3517_v10 = vld [vmem:[#allocation5 + $0x204] ss:$16 sps:$4 sm:$0xff]   ;;  %v3520_v12 = vld [vmem:[#allocation5 + $0x1ec] ss:$16 sps:$4 sm:$0xff]   ;;  %v427_v13 = vpack.c.bf16 %v420_v8, %v413_v7  ;;  %v3515_v14 = vld [vmem:[#allocation5 + $0x200] ss:$16 sps:$4 sm:$0xff]   ;;  %s4419_s15 = scalar_lea.hbm %s4472_s9, %s3219_s19 }
  0xbd   : > { %1818 = vmatprep.subr.bf16.mxu1 %v3459_v29  ;;  %v3518_v15 = vld [vmem:[#allocation5 + $0x1e8] ss:$16 sps:$4 sm:$0xff]   ;;  %v3523_v16 = vld [vmem:[#allocation5 + $0x224] ss:$16 sps:$4 sm:$0xff]   ;;  %v3526_v17 = vld [vmem:[#allocation5 + $0x20c] ss:$16 sps:$4 sm:$0xff]  }
  0xbe   : > { %1649 = vmatpush1.bf16.msra.mxu0 %v3460_v31  ;;  %v3521_v18 = vld [vmem:[#allocation5 + $0x220] ss:$16 sps:$4 sm:$0xff]   ;;  %v3524_v19 = vld [vmem:[#allocation5 + $0x208] ss:$16 sps:$4 sm:$0xff]   ;;  %v3529_v20 = vld [vmem:[#allocation5 + $0x244] ss:$16 sps:$4 sm:$0xff]  }
  0xbf   : > { %1650 = vmatprep.subr.bf16.mxu0 %v3461_v32  ;;  %v3532_v21 = vld [vmem:[#allocation5 + $0x22c] ss:$16 sps:$4 sm:$0xff]   ;;  %v3527_v22 = vld [vmem:[#allocation5 + $0x240] ss:$16 sps:$4 sm:$0xff]   ;;  %v3530_v23 = vld [vmem:[#allocation5 + $0x228] ss:$16 sps:$4 sm:$0xff]  }
  0xc0   : > { %1819 = vmatpush1.bf16.msra.mxu1 %v3457_v30  ;;  %v3535_v24 = vld [vmem:[#allocation5 + $0x264] ss:$16 sps:$4 sm:$0xff]   ;;  %v3538_v25 = vld [vmem:[#allocation5 + $0x24c] ss:$16 sps:$4 sm:$0xff]   ;;  %v3533_v26 = vld [vmem:[#allocation5 + $0x260] ss:$16 sps:$4 sm:$0xff]  }
  0xc1   : > { %1820 = vmatprep.subr.bf16.mxu1 %v3465_v33  ;;  %v3536_v27 = vld [vmem:[#allocation5 + $0x248] ss:$16 sps:$4 sm:$0xff]   ;;  %v3541_v28 = vld [vmem:[#allocation5 + $0x284] ss:$16 sps:$4 sm:$0xff]   ;;  %v3544_v29 = vld [vmem:[#allocation5 + $0x26c] ss:$16 sps:$4 sm:$0xff]  }
  0xc2   : > { %1651 = vmatpush1.bf16.msra.mxu0 %v3466_v34  ;;  %v3539_v30 = vld [vmem:[#allocation5 + $0x280] ss:$16 sps:$4 sm:$0xff]   ;;  %v3542_v31 = vld [vmem:[#allocation5 + $0x268] ss:$16 sps:$4 sm:$0xff]   ;;  %v3547_v32 = vld [vmem:[#allocation5 + $0x2a4] ss:$16 sps:$4 sm:$0xff]  }
  0xc3   : > { %1652 = vmatprep.subr.bf16.mxu0 %v3467_v36  ;;  %v3550_v33 = vld [vmem:[#allocation5 + $0x28c] ss:$16 sps:$4 sm:$0xff]   ;;  %v3545_v34 = vld [vmem:[#allocation5 + $0x2a0] ss:$16 sps:$4 sm:$0xff]   ;;  %v3553_v36 = vld [vmem:[#allocation5 + $0x2c4] ss:$16 sps:$4 sm:$0xff]  }
  0xc4   : > { %1821 = vmatpush1.bf16.msra.mxu1 %v3463_v35  ;;  %v3548_v35 = vld [vmem:[#allocation5 + $0x288] ss:$16 sps:$4 sm:$0xff]   ;;  %v3571_v51 = vld [vmem:[#allocation5 + $0x324] ss:$16 sps:$4 sm:$0xff]   ;;  %v3574_v52 = vld [vmem:[#allocation5 + $0x30c] ss:$16 sps:$4 sm:$0xff]  }
  0xc5   : > { %1822 = vmatprep.subr.bf16.mxu1 %v3471_v37  ;;  %v3556_v37 = vld [vmem:[#allocation5 + $0x2ac] ss:$16 sps:$4 sm:$0xff]   ;;  %v3572_v54 = vld [vmem:[#allocation5 + $0x308] ss:$16 sps:$4 sm:$0xff]   ;;  %v3601_v8 = vld [vmem:[#allocation5 + $0x3c4] ss:$16 sps:$4 sm:$0xff]  }
  0xc6   : > { %1653 = vmatpush1.bf16.msra.mxu0 %v3472_v39  ;;  %v416_v39 = vld [vmem:[%s4338_s29 + $0x18] sm:$0xff]  ;;  %s2795_s1 = sshll.u32 %s409_s30, 4  ;;  %s2782_s17 = scalar_lea.sflag [#allocation4], %s4334_s27  ;;  %s4414_s1 = int_to_ptr.vmem [resolvable:$true] %s2795_s1 }
  0xc7   : > { %1654 = vmatprep.subr.bf16.mxu0 %v3473_v40  ;;  %v423_v40 = vld [vmem:[%s4338_s29 + $0x50] sm:$0xff]  ;;  %v3596_v7 = vld [vmem:[#allocation5 + $0x388] ss:$16 sps:$4 sm:$0xff]   ;;  %s3975_s18 = scalar_lea.vmem %s4414_s1, 128  ;;  %s4067_s13 = smov [#allocation11]  }
  0xc8   : > { %1823 = vmatpush1.bf16.msra.mxu1 %v3469_v38  ;;  %v3551_v38 = vld [vmem:[#allocation5 + $0x2c0] ss:$16 sps:$4 sm:$0xff]   ;;  %p3976_p3 = scmp.ne.s32.totalorder %s4414_s1, %s3975_s18  ;;  %s3979_s25 = sshll.u32 %s4067_s13, 4  ;;  %s3980_s25 = int_to_ptr.vmem [resolvable:$false] %s3979_s25 }
  0xc9   : > { %1824 = vmatprep.subr.bf16.mxu1 %v3477_v41  ;;  %v3554_v41 = vld [vmem:[#allocation5 + $0x2a8] ss:$16 sps:$4 sm:$0xff]   ;;  %s3981_s23 = scalar_lea.vmem %s3980_s25, 256  ;;  %p3982_p12 = scmp.lt.s32.totalorder %s4414_s1, %s3980_s25 }
  0xca   : > { %1655 = vmatpush1.bf16.msra.mxu0 %v3478_v42  ;;  %v430_v42 = vpack.c.bf16 %v423_v40, %v416_v39  ;;  %v3637_v39 = vld [vmem:[#allocation5 + $0x484] ss:$16 sps:$4 sm:$0xff]   ;;  %v3640_v40 = vld [vmem:[#allocation5 + $0x46c] ss:$16 sps:$4 sm:$0xff]   ;;  %p3977_p5 = pnand %p3976_p3, %p4282_p10  ;;  %p3983_p2 = scmp.lt.s32.totalorder %s3981_s23, %s3975_s18 }
  0xcb   : > { %1656 = vmatprep.subr.bf16.mxu0 %v3479_v44  ;;  %v3562_v44 = vld [vmem:[#allocation5 + $0x2cc] ss:$16 sps:$4 sm:$0xff]  }
  0xcc   : > { %1825 = vmatpush1.bf16.msra.mxu1 %v3475_v43  ;;  %v3559_v43 = vld [vmem:[#allocation5 + $0x2e4] ss:$16 sps:$4 sm:$0xff]   ;;  %p3978_p7 = pneg %p3977_p5  ;;  %p3984_p1 = por %p3983_p2, %p3982_p12 }
  0xcd   : > { %1826 = vmatprep.subr.bf16.mxu1 %v3483_v45  ;;  %v3557_v45 = vld [vmem:[#allocation5 + $0x2e0] ss:$16 sps:$4 sm:$0xff]  }
  0xce   : > { %1657 = vmatpush1.bf16.msra.mxu0 %v3484_v47  ;;  %v3565_v47 = vld [vmem:[#allocation5 + $0x304] ss:$16 sps:$4 sm:$0xff]   ;;  %p3985_p13 = pnand %p3984_p1, %p3978_p7 }
  0xcf   : > { %1658 = vmatprep.subr.bf16.mxu0 %v3485_v48  ;;  %v3568_v48 = vld [vmem:[#allocation5 + $0x2ec] ss:$16 sps:$4 sm:$0xff]  }
  0xd0   : > { %1827 = vmatpush1.bf16.msra.mxu1 %v3481_v46  ;;  %v3560_v46 = vld [vmem:[#allocation5 + $0x2c8] ss:$16 sps:$4 sm:$0xff]  }
  0xd1   : > { %1828 = vmatprep.subr.bf16.mxu1 %v3489_v49  ;;  %v3563_v49 = vld [vmem:[#allocation5 + $0x300] ss:$16 sps:$4 sm:$0xff]  }
  0xd2   : > { %1659 = vmatpush1.bf16.msra.mxu0 %v3490_v53  ;;  %v3569_v53 = vld [vmem:[#allocation5 + $0x320] ss:$16 sps:$4 sm:$0xff]  }
  0xd3   : > { %1660 = vmatprep.subr.bf16.mxu0 %v3491_v55  ;;  %v3577_v55 = vld [vmem:[#allocation5 + $0x344] ss:$16 sps:$4 sm:$0xff]  }
  0xd4   : > { %1829 = vmatpush1.bf16.msra.mxu1 %v3487_v50  ;;  %v3566_v50 = vld [vmem:[#allocation5 + $0x2e8] ss:$16 sps:$4 sm:$0xff]  }
  0xd5   : > { %1830 = vmatprep.subr.bf16.mxu1 %v3495_v56  ;;  %v3580_v56 = vld [vmem:[#allocation5 + $0x32c] ss:$16 sps:$4 sm:$0xff]  }
  0xd6   : > { %1661 = vmatpush1.bf16.msra.mxu0 %v3496_v57  ;;  %v3575_v57 = vld [vmem:[#allocation5 + $0x340] ss:$16 sps:$4 sm:$0xff]  }
  0xd7   : > { %1662 = vmatprep.subr.bf16.mxu0 %v3497_v59  ;;  %v3583_v59 = vld [vmem:[#allocation5 + $0x364] ss:$16 sps:$4 sm:$0xff]  }
  0xd8   : > { %1831 = vmatpush1.bf16.msra.mxu1 %v3493_v58  ;;  %v3578_v58 = vld [vmem:[#allocation5 + $0x328] ss:$16 sps:$4 sm:$0xff]  }
  0xd9   : > { %1832 = vmatprep.subr.bf16.mxu1 %v3501_v60  ;;  %v3586_v60 = vld [vmem:[#allocation5 + $0x34c] ss:$16 sps:$4 sm:$0xff]  }
  0xda   : > { %1663 = vmatpush1.bf16.msra.mxu0 %v3502_v61  ;;  %v3581_v61 = vld [vmem:[#allocation5 + $0x360] ss:$16 sps:$4 sm:$0xff]  }
  0xdb   : > { %1664 = vmatprep.subr.bf16.mxu0 %v3503_v63  ;;  %v3589_v63 = vld [vmem:[#allocation5 + $0x384] ss:$16 sps:$4 sm:$0xff]  }
  0xdc   : > { %1833 = vmatpush1.bf16.msra.mxu1 %v3499_v62  ;;  %v3584_v62 = vld [vmem:[#allocation5 + $0x348] ss:$16 sps:$4 sm:$0xff]  }
  0xdd   : > { %1834 = vmatprep.subr.bf16.mxu1 %v3507_v1  ;;  %v3592_v1 = vld [vmem:[#allocation5 + $0x36c] ss:$16 sps:$4 sm:$0xff]  }
  0xde   : > { %1665 = vmatpush1.bf16.msra.mxu0 %v3508_v2  ;;  %v3587_v2 = vld [vmem:[#allocation5 + $0x380] ss:$16 sps:$4 sm:$0xff]  }
  0xdf   : > { %1666 = vmatprep.subr.bf16.mxu0 %v3509_v4  ;;  %v3595_v4 = vld [vmem:[#allocation5 + $0x3a4] ss:$16 sps:$4 sm:$0xff]  }
  0xe0   : > { %1835 = vmatpush1.bf16.msra.mxu1 %v3505_v3  ;;  %v3590_v3 = vld [vmem:[#allocation5 + $0x368] ss:$16 sps:$4 sm:$0xff]  }
  0xe1   : > { %1836 = vmatprep.subr.bf16.mxu1 %v3513_v5  ;;  %v3598_v5 = vld [vmem:[#allocation5 + $0x38c] ss:$16 sps:$4 sm:$0xff]  }
  0xe2   : > { %1667 = vmatpush1.bf16.msra.mxu0 %v3514_v6  ;;  %v3593_v6 = vld [vmem:[#allocation5 + $0x3a0] ss:$16 sps:$4 sm:$0xff]  }
  0xe3   : > { %1679 = vmatprep.subr.bf16.mxu0 %v3517_v10  ;;  %v3599_v10 = vld [vmem:[#allocation5 + $0x3c0] ss:$16 sps:$4 sm:$0xff]  }
  0xe4   : > { %1837 = vmatpush1.bf16.msra.mxu1 %v3511_v9  ;;  %v3604_v9 = vld [vmem:[#allocation5 + $0x3ac] ss:$16 sps:$4 sm:$0xff]  }
  0xe5   : > { %1838 = vmatprep.subr.bf16.mxu1 %v3520_v12  ;;  %1669 = vmatmul.mubr.bf16.vlgmr.msra.gmra.mrb[0].mxu0 %v427_v13  ;;  %v3602_v12 = vld [vmem:[#allocation5 + $0x3a8] ss:$16 sps:$4 sm:$0xff]  }
  0xe6   : > { %1680 = vmatpush1.bf16.msra.mxu0 %v3515_v14  ;;  %1711 = vmatprep.mubr.bf16.mxu0 %v430_v42  ;;  %v3610_v14 = vld [vmem:[#allocation5 + $0x3cc] ss:$16 sps:$4 sm:$0xff]  }
  0xe7   : > { %1681 = vmatprep.subr.bf16.mxu0 %v3523_v16  ;;  %v415_v16 = vld [vmem:[%s4338_s29 + $0x10] sm:$0xff] }
  0xe8   : > { %1839 = vmatpush1.bf16.msra.mxu1 %v3518_v15  ;;  %v3605_v15 = vld [vmem:[#allocation5 + $0x3e0] ss:$16 sps:$4 sm:$0xff]  }
  0xe9   : > { %1851 = vmatprep.subr.bf16.mxu1 %v3526_v17  ;;  %v422_v17 = vld [vmem:[%s4338_s29 + $0x48] sm:$0xff] }
  0xea   : > { %1682 = vmatpush1.bf16.msra.mxu0 %v3521_v18  ;;  %v3608_v18 = vld [vmem:[#allocation5 + $0x3c8] ss:$16 sps:$4 sm:$0xff]  }
  0xeb   : > { %1841 = vmatmul.mubr.bf16.vlgmr.msra.gmra.mrb[4].mxu1 %v427_v13  ;;  %1683 = vmatprep.subr.bf16.mxu0 %v3529_v20  ;;  %v3607_v13 = vld [vmem:[#allocation5 + $0x3e4] ss:$16 sps:$4 sm:$0xff]   ;;  %v3616_v20 = vld [vmem:[#allocation5 + $0x3ec] ss:$16 sps:$4 sm:$0xff]  }
  0xec   : > { %1852 = vmatpush1.bf16.msra.mxu1 %v3524_v19  ;;  %1883 = vmatprep.mubr.bf16.mxu1 %v430_v42  ;;  %v3613_v19 = vld [vmem:[#allocation5 + $0x404] ss:$16 sps:$4 sm:$0xff]   ;;  %v3638_v42 = vld [vmem:[#allocation5 + $0x468] ss:$16 sps:$4 sm:$0xff]  }
  0xed   : > { %1853 = vmatprep.subr.bf16.mxu1 %v3532_v21  ;;  %v429_v21 = vpack.c.bf16 %v422_v17, %v415_v16  ;;  %v3692_v16 = vld [vmem:[#allocation5 + $0x588] ss:$16 sps:$4 sm:$0xff]   ;;  %v3697_v17 = vld [vmem:[#allocation5 + $0x5c4] ss:$16 sps:$4 sm:$0xff]  }
  0xee   : > { %1684 = vmatpush1.bf16.msra.mxu0 %v3527_v22  ;;  %v3611_v22 = vld [vmem:[#allocation5 + $0x400] ss:$16 sps:$4 sm:$0xff]  }
  0xef   : > { %1685 = vmatprep.subr.bf16.mxu0 %v3535_v24  ;;  %v3619_v24 = vld [vmem:[#allocation5 + $0x424] ss:$16 sps:$4 sm:$0xff]  }
  0xf0   : > { %1854 = vmatpush1.bf16.msra.mxu1 %v3530_v23  ;;  %v3614_v23 = vld [vmem:[#allocation5 + $0x3e8] ss:$16 sps:$4 sm:$0xff]  }
  0xf1   : > { %1855 = vmatprep.subr.bf16.mxu1 %v3538_v25  ;;  %v3622_v25 = vld [vmem:[#allocation5 + $0x40c] ss:$16 sps:$4 sm:$0xff]  }
  0xf2   : > { %1686 = vmatpush1.bf16.msra.mxu0 %v3533_v26  ;;  %v418_v26 = vld [vmem:[%s4338_s29 + $0x28] sm:$0xff] }
  0xf3   : > { %1687 = vmatprep.subr.bf16.mxu0 %v3541_v28  ;;  %v3617_v28 = vld [vmem:[#allocation5 + $0x420] ss:$16 sps:$4 sm:$0xff]  }
  0xf4   : > { %1856 = vmatpush1.bf16.msra.mxu1 %v3536_v27  ;;  %v425_v27 = vld [vmem:[%s4338_s29 + $0x60] sm:$0xff] }
  0xf5   : > { %1857 = vmatprep.subr.bf16.mxu1 %v3544_v29  ;;  %v432_v29 = vpack.c.bf16 %v425_v27, %v418_v26  ;;  %v3704_v26 = vld [vmem:[#allocation5 + $0x5c8] ss:$16 sps:$4 sm:$0xff]   ;;  %v3715_v27 = vld [vmem:[#allocation7 + $0x4] ss:$8 sps:$4 sm:$0xff]  }
  0xf6   : > { %1688 = vmatpush1.bf16.msra.mxu0 %v3539_v30  ;;  %v3620_v30 = vld [vmem:[#allocation5 + $0x408] ss:$16 sps:$4 sm:$0xff]  }
  0xf7   : > { %1689 = vmatprep.subr.bf16.mxu0 %v3547_v32  ;;  %v3628_v32 = vld [vmem:[#allocation5 + $0x42c] ss:$16 sps:$4 sm:$0xff]  }
  0xf8   : > { %1858 = vmatpush1.bf16.msra.mxu1 %v3542_v31  ;;  %v3625_v31 = vld [vmem:[#allocation5 + $0x444] ss:$16 sps:$4 sm:$0xff]  }
  0xf9   : > { %1859 = vmatprep.subr.bf16.mxu1 %v3550_v33  ;;  %v3623_v33 = vld [vmem:[#allocation5 + $0x440] ss:$16 sps:$4 sm:$0xff]  }
  0xfa   : > { %1690 = vmatpush1.bf16.msra.mxu0 %v3545_v34  ;;  %v3626_v34 = vld [vmem:[#allocation5 + $0x428] ss:$16 sps:$4 sm:$0xff]  }
  0xfb   : > { %1691 = vmatprep.subr.bf16.mxu0 %v3553_v36  ;;  %v3634_v36 = vld [vmem:[#allocation5 + $0x44c] ss:$16 sps:$4 sm:$0xff]  }
  0xfc   : > { %1860 = vmatpush1.bf16.msra.mxu1 %v3548_v35  ;;  %v3631_v35 = vld [vmem:[#allocation5 + $0x464] ss:$16 sps:$4 sm:$0xff]  }
  0xfd   : > { %1861 = vmatprep.subr.bf16.mxu1 %v3556_v37  ;;  %v3629_v37 = vld [vmem:[#allocation5 + $0x460] ss:$16 sps:$4 sm:$0xff]  }
  0xfe   : > { %1692 = vmatpush1.bf16.msra.mxu0 %v3551_v38  ;;  %v3632_v38 = vld [vmem:[#allocation5 + $0x448] ss:$16 sps:$4 sm:$0xff]  }
  0xff   : > { %1693 = vmatprep.subr.bf16.mxu0 %v3559_v43  ;;  %v3643_v43 = vld [vmem:[#allocation5 + $0x4a4] ss:$16 sps:$4 sm:$0xff]  }
 0x100   : > { %1862 = vmatpush1.bf16.msra.mxu1 %v3554_v41  ;;  %v3635_v41 = vld [vmem:[#allocation5 + $0x480] ss:$16 sps:$4 sm:$0xff]  }
 0x101   : > { %1863 = vmatprep.subr.bf16.mxu1 %v3562_v44  ;;  %v3646_v44 = vld [vmem:[#allocation5 + $0x48c] ss:$16 sps:$4 sm:$0xff]  }
 0x102   : > { %1694 = vmatpush1.bf16.msra.mxu0 %v3557_v45  ;;  %v3641_v45 = vld [vmem:[#allocation5 + $0x4a0] ss:$16 sps:$4 sm:$0xff]  }
 0x103   : > { %1695 = vmatprep.subr.bf16.mxu0 %v3565_v47  ;;  %v3649_v47 = vld [vmem:[#allocation5 + $0x4c4] ss:$16 sps:$4 sm:$0xff]  }
 0x104   : > { %1864 = vmatpush1.bf16.msra.mxu1 %v3560_v46  ;;  %v3644_v46 = vld [vmem:[#allocation5 + $0x488] ss:$16 sps:$4 sm:$0xff]  }
 0x105   : > { %1865 = vmatprep.subr.bf16.mxu1 %v3568_v48  ;;  %v3652_v48 = vld [vmem:[#allocation5 + $0x4ac] ss:$16 sps:$4 sm:$0xff]  }
 0x106   : > { %1696 = vmatpush1.bf16.msra.mxu0 %v3563_v49  ;;  %v3647_v49 = vld [vmem:[#allocation5 + $0x4c0] ss:$16 sps:$4 sm:$0xff]  }
 0x107   : > { %1697 = vmatprep.subr.bf16.mxu0 %v3571_v51  ;;  %v3655_v51 = vld [vmem:[#allocation5 + $0x4e4] ss:$16 sps:$4 sm:$0xff]  }
 0x108   : > { %1866 = vmatpush1.bf16.msra.mxu1 %v3566_v50  ;;  %v3650_v50 = vld [vmem:[#allocation5 + $0x4a8] ss:$16 sps:$4 sm:$0xff]  }
 0x109   : > { %1867 = vmatprep.subr.bf16.mxu1 %v3574_v52  ;;  %v3658_v52 = vld [vmem:[#allocation5 + $0x4cc] ss:$16 sps:$4 sm:$0xff]  }
 0x10a   : > { %1698 = vmatpush1.bf16.msra.mxu0 %v3569_v53  ;;  %v3653_v53 = vld [vmem:[#allocation5 + $0x4e0] ss:$16 sps:$4 sm:$0xff]  }
 0x10b   : > { %1699 = vmatprep.subr.bf16.mxu0 %v3577_v55  ;;  %v3661_v55 = vld [vmem:[#allocation5 + $0x504] ss:$16 sps:$4 sm:$0xff]  }
 0x10c   : > { %1868 = vmatpush1.bf16.msra.mxu1 %v3572_v54  ;;  %v3656_v54 = vld [vmem:[#allocation5 + $0x4c8] ss:$16 sps:$4 sm:$0xff]  }
 0x10d   : > { %1869 = vmatprep.subr.bf16.mxu1 %v3580_v56  ;;  %v3664_v56 = vld [vmem:[#allocation5 + $0x4ec] ss:$16 sps:$4 sm:$0xff]  }
 0x10e   : > { %1700 = vmatpush1.bf16.msra.mxu0 %v3575_v57  ;;  %v3659_v57 = vld [vmem:[#allocation5 + $0x500] ss:$16 sps:$4 sm:$0xff]  }
 0x10f   : > { %1701 = vmatprep.subr.bf16.mxu0 %v3583_v59  ;;  %v3667_v59 = vld [vmem:[#allocation5 + $0x524] ss:$16 sps:$4 sm:$0xff]  }
 0x110   : > { %1870 = vmatpush1.bf16.msra.mxu1 %v3578_v58  ;;  %v3662_v58 = vld [vmem:[#allocation5 + $0x4e8] ss:$16 sps:$4 sm:$0xff]  }
 0x111   : > { %1871 = vmatprep.subr.bf16.mxu1 %v3586_v60  ;;  %v3670_v60 = vld [vmem:[#allocation5 + $0x50c] ss:$16 sps:$4 sm:$0xff]  }
 0x112   : > { %1702 = vmatpush1.bf16.msra.mxu0 %v3581_v61  ;;  %v3665_v61 = vld [vmem:[#allocation5 + $0x520] ss:$16 sps:$4 sm:$0xff]  }
 0x113   : > { %1703 = vmatprep.subr.bf16.mxu0 %v3589_v63  ;;  %v3673_v63 = vld [vmem:[#allocation5 + $0x544] ss:$16 sps:$4 sm:$0xff]  }
 0x114   : > { %1872 = vmatpush1.bf16.msra.mxu1 %v3584_v62  ;;  %v3668_v62 = vld [vmem:[#allocation5 + $0x508] ss:$16 sps:$4 sm:$0xff]  }
 0x115   : > { %1873 = vmatprep.subr.bf16.mxu1 %v3592_v1  ;;  %v3676_v1 = vld [vmem:[#allocation5 + $0x52c] ss:$16 sps:$4 sm:$0xff]  }
 0x116   : > { %1704 = vmatpush1.bf16.msra.mxu0 %v3587_v2  ;;  %v3671_v2 = vld [vmem:[#allocation5 + $0x540] ss:$16 sps:$4 sm:$0xff]  }
 0x117   : > { %1705 = vmatprep.subr.bf16.mxu0 %v3595_v4  ;;  %v3679_v4 = vld [vmem:[#allocation5 + $0x564] ss:$16 sps:$4 sm:$0xff]  }
 0x118   : > { %1874 = vmatpush1.bf16.msra.mxu1 %v3590_v3  ;;  %v3674_v3 = vld [vmem:[#allocation5 + $0x528] ss:$16 sps:$4 sm:$0xff]  }
 0x119   : > { %1875 = vmatprep.subr.bf16.mxu1 %v3598_v5  ;;  %v3682_v5 = vld [vmem:[#allocation5 + $0x54c] ss:$16 sps:$4 sm:$0xff]  }
 0x11a   : > { %1706 = vmatpush1.bf16.msra.mxu0 %v3593_v6  ;;  %v3677_v6 = vld [vmem:[#allocation5 + $0x560] ss:$16 sps:$4 sm:$0xff]  }
 0x11b   : > { %1707 = vmatprep.subr.bf16.mxu0 %v3601_v8  ;;  %v3685_v8 = vld [vmem:[#allocation5 + $0x584] ss:$16 sps:$4 sm:$0xff]  }
 0x11c   : > { %1876 = vmatpush1.bf16.msra.mxu1 %v3596_v7  ;;  %v3680_v7 = vld [vmem:[#allocation5 + $0x548] ss:$16 sps:$4 sm:$0xff]  }
 0x11d   : > { %1877 = vmatprep.subr.bf16.mxu1 %v3604_v9  ;;  %v3688_v9 = vld [vmem:[#allocation5 + $0x56c] ss:$16 sps:$4 sm:$0xff]  }
 0x11e   : > { %1708 = vmatpush1.bf16.msra.mxu0 %v3599_v10  ;;  %v3683_v10 = vld [vmem:[#allocation5 + $0x580] ss:$16 sps:$4 sm:$0xff]  }
 0x11f   : > { %1709 = vmatprep.subr.bf16.mxu0 %v3607_v13  ;;  %v3691_v13 = vld [vmem:[#allocation5 + $0x5a4] ss:$16 sps:$4 sm:$0xff]  }
 0x120   : > { %1878 = vmatpush1.bf16.msra.mxu1 %v3602_v12  ;;  %v3686_v12 = vld [vmem:[#allocation5 + $0x568] ss:$16 sps:$4 sm:$0xff]  }
 0x121   : > { %1879 = vmatprep.subr.bf16.mxu1 %v3610_v14  ;;  %v3694_v14 = vld [vmem:[#allocation5 + $0x58c] ss:$16 sps:$4 sm:$0xff]  }
 0x122   : > { %1710 = vmatpush1.bf16.msra.mxu0 %v3605_v15  ;;  %v3689_v15 = vld [vmem:[#allocation5 + $0x5a0] ss:$16 sps:$4 sm:$0xff]  }
 0x123   : > { %1722 = vmatprep.subr.bf16.mxu0 %v3613_v19  ;;  %v3695_v19 = vld [vmem:[#allocation5 + $0x5c0] ss:$16 sps:$4 sm:$0xff]  }
 0x124   : > { %1880 = vmatpush1.bf16.msra.mxu1 %v3608_v18  ;;  %v3700_v18 = vld [vmem:[#allocation5 + $0x5ac] ss:$16 sps:$4 sm:$0xff]  }
 0x125   : > { %1881 = vmatprep.subr.bf16.mxu1 %v3616_v20  ;;  %1712 = vmatmul.mubr.bf16.vlgmr.msra.gmra.mrb[0].mxu0 %v429_v21  ;;  %v3698_v20 = vld [vmem:[#allocation5 + $0x5a8] ss:$16 sps:$4 sm:$0xff]  }
 0x126   : > { %1723 = vmatpush1.bf16.msra.mxu0 %v3611_v22  ;;  %1754 = vmatprep.mubr.bf16.mxu0 %v432_v29  ;;  %v3706_v22 = vld [vmem:[#allocation5 + $0x5cc] ss:$16 sps:$4 sm:$0xff]  }
 0x127   : > { %1724 = vmatprep.subr.bf16.mxu0 %v3619_v24  ;;  %v417_v24 = vld [vmem:[%s4338_s29 + $0x20] sm:$0xff] }
 0x128   : > { %1882 = vmatpush1.bf16.msra.mxu1 %v3614_v23  ;;  %v3701_v23 = vld [vmem:[#allocation5 + $0x5e0] ss:$16 sps:$4 sm:$0xff]  }
 0x129   : > { %1894 = vmatprep.subr.bf16.mxu1 %v3622_v25  ;;  %v424_v25 = vld [vmem:[%s4338_s29 + $0x58] sm:$0xff] }
 0x12a   : > { %1725 = vmatpush1.bf16.msra.mxu0 %v3617_v28  ;;  %v3709_v28 = vld [vmem:[#allocation5 + $0x5ec] ss:$16 sps:$4 sm:$0xff]  }
 0x12b   : > { %1884 = vmatmul.mubr.bf16.vlgmr.msra.gmra.mrb[4].mxu1 %v429_v21  ;;  %1726 = vmatprep.subr.bf16.mxu0 %v3625_v31  ;;  %v3703_v21 = vld [vmem:[#allocation5 + $0x5e4] ss:$16 sps:$4 sm:$0xff]   ;;  %v3707_v31 = vld [vmem:[#allocation5 + $0x5e8] ss:$16 sps:$4 sm:$0xff]  }
 0x12c   : > { %1895 = vmatpush1.bf16.msra.mxu1 %v3620_v30  ;;  %1926 = vmatprep.mubr.bf16.mxu1 %v432_v29  ;;  %v431_v29 = vpack.c.bf16 %v424_v25, %v417_v24  ;;  %v3713_v30 = vld [vmem:[#allocation7] ss:$8 sps:$4 sm:$0xff]  }
 0x12d   : > { %1896 = vmatprep.subr.bf16.mxu1 %v3628_v32  ;;  %v3718_v32 = vld [vmem:[#allocation7 + $0x14] ss:$8 sps:$4 sm:$0xff]  }
 0x12e   : > { %1727 = vmatpush1.bf16.msra.mxu0 %v3623_v33  ;;  %v3712_v33 = vld [vmem:[#allocation5 + $0x60c] ss:$16 sps:$4 sm:$0xff]  }
 0x12f   : > { %1728 = vmatprep.subr.bf16.mxu0 %v3631_v35  ;;  %v3710_v35 = vld [vmem:[#allocation5 + $0x608] ss:$16 sps:$4 sm:$0xff]  }
 0x130   : > { %1897 = vmatpush1.bf16.msra.mxu1 %v3626_v34  ;;  %v3716_v34 = vld [vmem:[#allocation7 + $0x10] ss:$8 sps:$4 sm:$0xff]  }
 0x131   : > { %1898 = vmatprep.subr.bf16.mxu1 %v3634_v36  ;;  %v3721_v36 = vld [vmem:[#allocation7 + $0x24] ss:$8 sps:$4 sm:$0xff]  }
 0x132   : > { %1729 = vmatpush1.bf16.msra.mxu0 %v3629_v37  ;;  %v3719_v37 = vld [vmem:[#allocation7 + $0x20] ss:$8 sps:$4 sm:$0xff]  }
 0x133   : > { %1730 = vmatprep.subr.bf16.mxu0 %v3637_v39  ;;  %v3722_v39 = vld [vmem:[#allocation7 + $0x30] ss:$8 sps:$4 sm:$0xff]  }
 0x134   : > { %1899 = vmatpush1.bf16.msra.mxu1 %v3632_v38  ;;  %v3724_v38 = vld [vmem:[#allocation7 + $0x34] ss:$8 sps:$4 sm:$0xff]  }
 0x135   : > { %1900 = vmatprep.subr.bf16.mxu1 %v3640_v40  ;;  %v3727_v40 = vld [vmem:[#allocation7 + $0x44] ss:$8 sps:$4 sm:$0xff]  }
 0x136   : > { %1731 = vmatpush1.bf16.msra.mxu0 %v3635_v41  ;;  %v3725_v41 = vld [vmem:[#allocation7 + $0x40] ss:$8 sps:$4 sm:$0xff]  }
 0x137   : > { %1732 = vmatprep.subr.bf16.mxu0 %v3643_v43  ;;  %v3728_v43 = vld [vmem:[#allocation7 + $0x50] ss:$8 sps:$4 sm:$0xff]  }
 0x138   : > { %1901 = vmatpush1.bf16.msra.mxu1 %v3638_v42  ;;  %v3730_v42 = vld [vmem:[#allocation7 + $0x54] ss:$8 sps:$4 sm:$0xff]  }
 0x139   : > { %1902 = vmatprep.subr.bf16.mxu1 %v3646_v44  ;;  %v3733_v44 = vld [vmem:[#allocation7 + $0x64] ss:$8 sps:$4 sm:$0xff]  }
 0x13a   : > { %1733 = vmatpush1.bf16.msra.mxu0 %v3641_v45  ;;  %v3731_v45 = vld [vmem:[#allocation7 + $0x60] ss:$8 sps:$4 sm:$0xff]  }
 0x13b   : > { %1734 = vmatprep.subr.bf16.mxu0 %v3649_v47 }
 0x13c   : > { %1903 = vmatpush1.bf16.msra.mxu1 %v3644_v46 }
 0x13d   : > { %1904 = vmatprep.subr.bf16.mxu1 %v3652_v48  ;;  %v3734_v48 = vld [vmem:[#allocation7 + $0x70] ss:$8 sps:$4 sm:$0xff]  }
 0x13e   : > { %1735 = vmatpush1.bf16.msra.mxu0 %v3647_v49 }
 0x13f   : > { %1736 = vmatprep.subr.bf16.mxu0 %v3655_v51 }
 0x140   : > { %1905 = vmatpush1.bf16.msra.mxu1 %v3650_v50  ;;  %v3739_v50 = vld [vmem:[#allocation7 + $0x84] ss:$8 sps:$4 sm:$0xff]  }
 0x141   : > { %1906 = vmatprep.subr.bf16.mxu1 %v3658_v52  ;;  %v3742_v52 = vld [vmem:[#allocation7 + $0x94] ss:$8 sps:$4 sm:$0xff]  }
 0x142   : > { %1737 = vmatpush1.bf16.msra.mxu0 %v3653_v53  ;;  %v3740_v53 = vld [vmem:[#allocation7 + $0x90] ss:$8 sps:$4 sm:$0xff]  }
 0x143   : > { %1738 = vmatprep.subr.bf16.mxu0 %v3661_v55  ;;  %v3743_v55 = vld [vmem:[#allocation7 + $0xa0] ss:$8 sps:$4 sm:$0xff]  }
 0x144   : > { %1907 = vmatpush1.bf16.msra.mxu1 %v3656_v54  ;;  %v3745_v54 = vld [vmem:[#allocation7 + $0xa4] ss:$8 sps:$4 sm:$0xff]  }
 0x145   : > { %1908 = vmatprep.subr.bf16.mxu1 %v3664_v56  ;;  %v3748_v56 = vld [vmem:[#allocation7 + $0xb4] ss:$8 sps:$4 sm:$0xff]  }
 0x146   : > { %1739 = vmatpush1.bf16.msra.mxu0 %v3659_v57  ;;  %v3746_v57 = vld [vmem:[#allocation7 + $0xb0] ss:$8 sps:$4 sm:$0xff]  }
 0x147   : > { %1740 = vmatprep.subr.bf16.mxu0 %v3667_v59  ;;  %v3749_v59 = vld [vmem:[#allocation7 + $0xc0] ss:$8 sps:$4 sm:$0xff]  }
 0x148   : > { %1909 = vmatpush1.bf16.msra.mxu1 %v3662_v58  ;;  %v3751_v58 = vld [vmem:[#allocation7 + $0xc4] ss:$8 sps:$4 sm:$0xff]  }
 0x149   : > { %1910 = vmatprep.subr.bf16.mxu1 %v3670_v60  ;;  %v3754_v60 = vld [vmem:[#allocation7 + $0xd4] ss:$8 sps:$4 sm:$0xff]  }
 0x14a   : > { %1741 = vmatpush1.bf16.msra.mxu0 %v3665_v61  ;;  %v3752_v61 = vld [vmem:[#allocation7 + $0xd0] ss:$8 sps:$4 sm:$0xff]  }
 0x14b   : > { %1742 = vmatprep.subr.bf16.mxu0 %v3673_v63  ;;  %v3755_v63 = vld [vmem:[#allocation7 + $0xe0] ss:$8 sps:$4 sm:$0xff]  }
 0x14c   : > { %1911 = vmatpush1.bf16.msra.mxu1 %v3668_v62  ;;  %v3757_v62 = vld [vmem:[#allocation7 + $0xe4] ss:$8 sps:$4 sm:$0xff]  }
 0x14d   : > { %1912 = vmatprep.subr.bf16.mxu1 %v3676_v1  ;;  %v3760_v1 = vld [vmem:[#allocation7 + $0xf4] ss:$8 sps:$4 sm:$0xff]  }
 0x14e   : > { %1743 = vmatpush1.bf16.msra.mxu0 %v3671_v2  ;;  %v3758_v2 = vld [vmem:[#allocation7 + $0xf0] ss:$8 sps:$4 sm:$0xff]  }
 0x14f   : > { %1744 = vmatprep.subr.bf16.mxu0 %v3679_v4  ;;  %v3809_v4 = vld [vmem:[#allocation8 + $0x40] sm:$0xff]  }
 0x150   : > { %1913 = vmatpush1.bf16.msra.mxu1 %v3674_v3  ;;  %v3763_v3 = vld [vmem:[#allocation7 + $0x104] ss:$8 sps:$4 sm:$0xff]  }
 0x151   : > { %1914 = vmatprep.subr.bf16.mxu1 %v3682_v5  ;;  %v3810_v5 = vld [vmem:[#allocation8] sm:$0xff]  }
 0x152   : > { %1745 = vmatpush1.bf16.msra.mxu0 %v3677_v6  ;;  %v3811_v6 = vld [vmem:[#allocation8 + $0x48] sm:$0xff]  }
 0x153   : > { %1746 = vmatprep.subr.bf16.mxu0 %v3685_v8  ;;  %v3813_v8 = vld [vmem:[#allocation8 + $0x50] sm:$0xff]  }
 0x154   : > { %1915 = vmatpush1.bf16.msra.mxu1 %v3680_v7  ;;  %v3812_v7 = vld [vmem:[#allocation8 + $0x8] sm:$0xff]  }
 0x155   : > { %1916 = vmatprep.subr.bf16.mxu1 %v3688_v9  ;;  %v3814_v9 = vld [vmem:[#allocation8 + $0x10] sm:$0xff]  }
 0x156   : > { %1747 = vmatpush1.bf16.msra.mxu0 %v3683_v10  ;;  %v3815_v10 = vld [vmem:[#allocation8 + $0x58] sm:$0xff]  }
 0x157   : > { %1748 = vmatprep.subr.bf16.mxu0 %v3691_v13  ;;  %v3817_v13 = vld [vmem:[#allocation8 + $0x60] sm:$0xff]  }
 0x158   : > { %1917 = vmatpush1.bf16.msra.mxu1 %v3686_v12  ;;  %v3816_v12 = vld [vmem:[#allocation8 + $0x18] sm:$0xff]  }
 0x159   : > { %1918 = vmatprep.subr.bf16.mxu1 %v3694_v14  ;;  %v3818_v14 = vld [vmem:[#allocation8 + $0x20] sm:$0xff]  }
 0x15a   : > { %1749 = vmatpush1.bf16.msra.mxu0 %v3689_v15  ;;  %v3819_v15 = vld [vmem:[#allocation8 + $0x68] sm:$0xff]  }
 0x15b   : > { %1750 = vmatprep.subr.bf16.mxu0 %v3697_v17 }
 0x15c   : > { %1919 = vmatpush1.bf16.msra.mxu1 %v3692_v16  ;;  %v632_v16 = vlaneseq }
 0x15d   : > { %1920 = vmatprep.subr.bf16.mxu1 %v3700_v18 }
 0x15e   : > { %1751 = vmatpush1.bf16.msra.mxu0 %v3695_v19  ;;  %v4382_v17 = vshrl.u32 %v632_v16, 7  ;;  %v630_v19 = vld [vmem:[%s4465_s2] sm:$0xf]  ;;  %v3796_v16 = vld [vmem:[#allocation7 + $0x1b4] ss:$8 sps:$4 sm:$0xff]  }
 0x15f   : > { %1752 = vmatprep.subr.bf16.mxu0 %v3703_v21 }
 0x160   : > { %1921 = vmatpush1.bf16.msra.mxu1 %v3698_v20  ;;  %v634_v18 = vsub.s32 0, %v4382_v17  ;;  %v638_v20 = vsub.s32 1, %v4382_v17 }
 0x161   : > { %1922 = vmatprep.subr.bf16.mxu1 %v3706_v22 }
 0x162   : > { %1753 = vmatpush1.bf16.msra.mxu0 %v3701_v23  ;;  %v635_v21 = vrot.slane %v630_v19, %v634_v18  ;;  %v639_v22 = vrot.slane %v630_v19, %v638_v20 }
 0x163   : > { %2388 = vmatprep.subr.bf16.mxu0 %v3715_v27 }
 0x164   : > { %1923 = vmatpush1.bf16.msra.mxu1 %v3704_v26 }
 0x165   : > { %1924 = vmatprep.subr.bf16.mxu1 %v3709_v28  ;;  %1755 = vmatmul.mubr.bf16.vlgmr.msra.gmra.mrb[0].mxu0 %v431_v29 }
 0x166   : > { %2389 = vmatpush1.bf16.msra.mxu0 %v3713_v30 }
 0x167   : > { %2390 = vmatprep.subr.bf16.mxu0 %v3718_v32 }
 0x168   : > { %1925 = vmatpush1.bf16.msra.mxu1 %v3707_v31 }
 0x169   : > { %1937 = vmatprep.subr.bf16.mxu1 %v3712_v33 }
 0x16a   : > { %2391 = vmatpush1.bf16.msra.mxu0 %v3716_v34 }
 0x16b   : > { %1927 = vmatmul.mubr.bf16.vlgmr.msra.gmra.mrb[4].mxu1 %v431_v29  ;;  %2392 = vmatprep.subr.bf16.mxu0 %v3721_v36 }
 0x16c   : > { %1938 = vmatpush1.bf16.msra.mxu1 %v3710_v35  ;;  %1969 = vmatprep.mubr.bf16.mxu1 %v4064_v0  ;;  %v3736_v0 = vld [vmem:[#allocation7 + $0x74] ss:$8 sps:$4 sm:$0xff]  }
 0x16d   : > { %3225 = vmatprep.subr.bf16.mxu1 %v3809_v4  ;;  %v3776_v4 = vld [vmem:[#allocation7 + $0x150] ss:$8 sps:$4 sm:$0xff]  }
 0x16e   : > { %2393 = vmatpush1.bf16.msra.mxu0 %v3719_v37 }
 0x16f   : > { %2394 = vmatprep.subr.bf16.mxu0 %v3724_v38 }
 0x172   : > { %2395 = vmatpush1.bf16.msra.mxu0 %v3722_v39 }
 0x173   : > { %2396 = vmatprep.subr.bf16.mxu0 %v3727_v40 }
 0x176   : > { %2397 = vmatpush1.bf16.msra.mxu0 %v3725_v41  ;;  %v3761_v41 = vld [vmem:[#allocation7 + $0x100] ss:$8 sps:$4 sm:$0xff]  }
 0x177   : > { %3119 = vmatmul.mubr.msk.bf16.vlgmr.msra.gmra.mrb[4].mxu1 %vm1632_vm0, %v4355_v11  ;;  %2398 = vmatprep.subr.bf16.mxu0 %v3730_v42  ;;  %v3737_v11 = vld [vmem:[#allocation7 + $0x80] ss:$8 sps:$4 sm:$0xff]   ;;  %v642_v42 = vsub.s32 2, %v4382_v17 }
 0x178   : > { %3226 = vmatpush3.bf16.msra.mxu1 %v3810_v5  ;;  %v3781_v5 = vld [vmem:[#allocation7 + $0x164] ss:$8 sps:$4 sm:$0xff]  }
 0x179   : > { %3227 = vmatprep.subr.bf16.mxu1 %v3811_v6  ;;  %v3779_v6 = vld [vmem:[#allocation7 + $0x160] ss:$8 sps:$4 sm:$0xff]  }
 0x17a   : > { %2399 = vmatpush1.bf16.msra.mxu0 %v3728_v43  ;;  %v3766_v43 = vld [vmem:[#allocation7 + $0x114] ss:$8 sps:$4 sm:$0xff]  }
 0x17b   : > { %2400 = vmatprep.subr.bf16.mxu0 %v3733_v44  ;;  %v646_v44 = vsub.s32 3, %v4382_v17  ;;  %v3826_v17 = vld [vmem:[#allocation10 + $0x8] sm:$0xff]  }
 0x17c   : > { %3228 = vmatpush3.bf16.msra.mxu1 %v3812_v7  ;;  %v3784_v7 = vld [vmem:[#allocation7 + $0x174] ss:$8 sps:$4 sm:$0xff]  }
 0x17d   : > { %3229 = vmatprep.subr.bf16.mxu1 %v3813_v8  ;;  %v3782_v8 = vld [vmem:[#allocation7 + $0x170] ss:$8 sps:$4 sm:$0xff]  }
 0x17e   : > { %v4374_v46 = vpop.f32.mrb[0].mxu1  ;;  %2401 = vmatpush1.bf16.msra.mxu0 %v3731_v45  ;;  %v643_v45 = vrot.slane %v630_v19, %v642_v42 }
 0x17f   : > { %v4376_v47 = vpop.f32.mrb[1].mxu1  ;;  %2402 = vmatprep.subr.bf16.mxu0 %v3736_v0  ;;  %v3764_v0 = vld [vmem:[#allocation7 + $0x110] ss:$8 sps:$4 sm:$0xff]  }
 0x180   : > { %v4378_v49 = vpop.f32.mrb[2].mxu1  ;;  %3230 = vmatpush3.bf16.msra.mxu1 %v3814_v9  ;;  %v3787_v9 = vld [vmem:[#allocation7 + $0x184] ss:$8 sps:$4 sm:$0xff]  }
 0x181   : > { %v4380_v51 = vpop.f32.mrb[3].mxu1  ;;  %3231 = vmatprep.subr.bf16.mxu1 %v3815_v10  ;;  %v3785_v10 = vld [vmem:[#allocation7 + $0x180] ss:$8 sps:$4 sm:$0xff]  }
 0x182   : > { %2403 = vmatpush1.bf16.msra.mxu0 %v3734_v48 }
 0x183   : > { %2404 = vmatprep.subr.bf16.mxu0 %v3739_v50 }
 0x184   : > { %3232 = vmatpush3.bf16.msra.mxu1 %v3816_v12  ;;  %v3790_v12 = vld [vmem:[#allocation7 + $0x194] ss:$8 sps:$4 sm:$0xff]  }
 0x185   : > { %3233 = vmatprep.subr.bf16.mxu1 %v3817_v13  ;;  %v3788_v13 = vld [vmem:[#allocation7 + $0x190] ss:$8 sps:$4 sm:$0xff]  }
 0x186   : > { %2405 = vmatpush1.bf16.msra.mxu0 %v3737_v11 }
 0x187   : > { %2406 = vmatprep.subr.bf16.mxu0 %v3742_v52 }
 0x188   : > { %3234 = vmatpush3.bf16.msra.mxu1 %v3818_v14  ;;  %v3793_v14 = vld [vmem:[#allocation7 + $0x1a4] ss:$8 sps:$4 sm:$0xff]  }
 0x189   : > { %3235 = vmatprep.subr.bf16.mxu1 %v3819_v15  ;;  %v3791_v15 = vld [vmem:[#allocation7 + $0x1a0] ss:$8 sps:$4 sm:$0xff]  }
 0x18a   : > { %2407 = vmatpush1.bf16.msra.mxu0 %v3740_v53  ;;  %v3772_v53 = vld [vmem:[#allocation7 + $0x134] ss:$8 sps:$4 sm:$0xff]  }
 0x18b   : > { %2408 = vmatprep.subr.bf16.mxu0 %v3745_v54 }
 0x18e   : > { %2409 = vmatpush1.bf16.msra.mxu0 %v3743_v55 }
 0x18f   : > { %2410 = vmatprep.subr.bf16.mxu0 %v3748_v56 }
 0x192   : > { %2411 = vmatpush1.bf16.msra.mxu0 %v3746_v57 }
 0x193   : > { %2412 = vmatprep.subr.bf16.mxu0 %v3751_v58 }
 0x196   : > { %2413 = vmatpush1.bf16.msra.mxu0 %v3749_v59  ;;  %v3770_v59 = vld [vmem:[#allocation7 + $0x130] ss:$8 sps:$4 sm:$0xff]  }
 0x197   : > { %2414 = vmatprep.subr.bf16.mxu0 %v3754_v60 }
 0x19a   : > { %2415 = vmatpush1.bf16.msra.mxu0 %v3752_v61 }
 0x19b   : > { %2416 = vmatprep.subr.bf16.mxu0 %v3757_v62  ;;  %v3775_v62 = vld [vmem:[#allocation7 + $0x144] ss:$8 sps:$4 sm:$0xff]  }
 0x19e   : > { %2417 = vmatpush1.bf16.msra.mxu0 %v3755_v63 }
 0x19f   : > { %2418 = vmatprep.subr.bf16.mxu0 %v3760_v1 }
 0x1a2   : > { %2419 = vmatpush1.bf16.msra.mxu0 %v3758_v2  ;;  %v3773_v2 = vld [vmem:[#allocation7 + $0x140] ss:$8 sps:$4 sm:$0xff]  }
 0x1a3   : > { %2431 = vmatprep.subr.bf16.mxu0 %v3763_v3  ;;  %v3778_v3 = vld [vmem:[#allocation7 + $0x154] ss:$8 sps:$4 sm:$0xff]  }
 0x238   : > { %v1756_v23 = vpop.f32.mrb[0].mxu0 }
 0x239   : > { %v3276_v24 = vadd.f32 %v1756_v23, %v635_v21  ;;  %v1758_v25 = vpop.f32.mrb[1].mxu0  ;;  %v3802_v23 = vld [vmem:[#allocation7 + $0x1d4] ss:$8 sps:$4 sm:$0xff]  }
 0x23a   : > { %v3278_v26 = vadd.f32 %v1758_v25, %v639_v22  ;;  %v1760_v27 = vpop.f32.mrb[2].mxu0  ;;  %v3805_v25 = vld [vmem:[#allocation7 + $0x1e4] ss:$8 sps:$4 sm:$0xff]  }
 0x23b   : > { %v3277_v28 = vadd.f32 %v3276_v24, %v4374_v46  ;;  %v3280_v29 = vadd.f32 %v1760_v27, %v635_v21  ;;  %v1762_v30 = vpop.f32.mrb[3].mxu0  ;;  %v647_v46 = vrot.slane %v630_v19, %v646_v44  ;;  %v3794_v19 = vld [vmem:[#allocation7 + $0x1b0] ss:$8 sps:$4 sm:$0xff]   ;;  %v3799_v21 = vld [vmem:[#allocation7 + $0x1c4] ss:$8 sps:$4 sm:$0xff]  }
 0x23c   : > { %v3279_v31 = vadd.f32 %v3278_v26, %v4376_v47  ;;  %v3282_v32 = vadd.f32 %v1762_v30, %v639_v22  ;;  %v3769_v47 = vld [vmem:[#allocation7 + $0x124] ss:$8 sps:$4 sm:$0xff]   ;;  %v3797_v22 = vld [vmem:[#allocation7 + $0x1c0] ss:$8 sps:$4 sm:$0xff]   ;;  %v3800_v24 = vld [vmem:[#allocation7 + $0x1d0] ss:$8 sps:$4 sm:$0xff]  }
 0x23d   : > { %v3281_v33 = vadd.f32 %v3280_v29, %v4378_v49  ;;  %v1980_v35 = vmax.f32 %v3277_v28, 0.0  ;;  %v3803_v26 = vld [vmem:[#allocation7 + $0x1e0] ss:$8 sps:$4 sm:$0xff]   ;;  %v3808_v27 = vld [vmem:[#allocation7 + $0x1f4] ss:$8 sps:$4 sm:$0xff]  }
 0x23e   : > { %v3283_v34 = vadd.f32 %v3282_v32, %v4380_v51  ;;  %v1981_v37 = vmax.f32 %v3279_v31, 0.0  ;;  %v3767_v51 = vld [vmem:[#allocation7 + $0x120] ss:$8 sps:$4 sm:$0xff]   ;;  %v3806_v28 = vld [vmem:[#allocation7 + $0x1f0] ss:$8 sps:$4 sm:$0xff]  }
 0x23f   : > { %v1984_v36 = vmax.f32 %v3281_v33, 0.0  ;;  %v3820_v29 = vld [vmem:[#allocation8 + $0x28] sm:$0xff]   ;;  %v3821_v30 = vld [vmem:[#allocation8 + $0x70] sm:$0xff]   ;;  %v3823_v32 = vld [vmem:[#allocation8 + $0x78] sm:$0xff]  }
 0x240   : > { %v1985_v38 = vmax.f32 %v3283_v34, 0.0  ;;  %3236 = vmatpush3.bf16.msra.mxu1 %v3820_v29  ;;  %v3822_v31 = vld [vmem:[#allocation8 + $0x30] sm:$0xff]   ;;  %v3824_v33 = vld [vmem:[#allocation8 + $0x38] sm:$0xff]   ;;  %v4065_v34 = vmov 0.0  }
 0x241   : > { %v1988_v39 = vpack.c.bf16 %v1984_v36, %v1980_v35  ;;  %3237 = vmatprep.subr.bf16.mxu1 %v3821_v30  ;;  %v2056_v35 = vld [vmem:[%s4467_s4] sm:$0x3] }
 0x242   : > { %v1989_v40 = vpack.c.bf16 %v1985_v38, %v1981_v37  ;;  %v2061_v36 = vrot.slane %v2056_v35, %v634_v18  ;;  %v2065_v37 = vrot.slane %v2056_v35, %v638_v20  ;;  %v3827_v18 = vld [vmem:[#allocation10 + $0x10] sm:$0xff]   ;;  %v3828_v20 = vld [vmem:[#allocation10 + $0x18] sm:$0xff]  }
 0x244   : > { %2420 = vmatprep.mubr.bf16.mxu0 %v1989_v40  ;;  %3238 = vmatpush3.bf16.msra.mxu1 %v3822_v31 }
 0x245   : > { %2421 = vmatmul.mubr.bf16.vlgmr.msra.gmra.mrb[4].mxu0 %v1988_v39  ;;  %3239 = vmatprep.subr.bf16.mxu1 %v3823_v32 }
 0x246   : > { %2432 = vmatpush1.bf16.msra.mxu0 %v3761_v41 }
 0x247   : > { %2433 = vmatprep.subr.bf16.mxu0 %v3766_v43 }
 0x248   : > { %3240 = vmatpush3.bf16.msra.mxu1 %v3824_v33 }
 0x249   : > { %3256 = vmatprep.subr.bf16.mxu1 %v4065_v34 }
 0x24a   : > { %v1971_v48 = vpop.f32.mrb[4].mxu1  ;;  %2434 = vmatpush1.bf16.msra.mxu0 %v3764_v0 }
 0x24b   : > { %v3284_v49 = vadd.f32 %v1971_v48, %v643_v45  ;;  %v1973_v50 = vpop.f32.mrb[5].mxu1  ;;  %2435 = vmatprep.subr.bf16.mxu0 %v3769_v47 }
 0x24c   : > { %v3285_v11 = vadd.f32 %v1973_v50, %v647_v46  ;;  %v1975_v52 = vpop.f32.mrb[6].mxu1 }
 0x24d   : > { %v3286_v54 = vadd.f32 %v1975_v52, %v643_v45  ;;  %v1977_v55 = vpop.f32.mrb[7].mxu1  ;;  %v1982_v57 = vmax.f32 %v3284_v49, 0.0  ;;  %v3830_v52 = vld [vmem:[#allocation10 + $0x28] sm:$0xff]  }
 0x24e   : > { %v3287_v56 = vadd.f32 %v1977_v55, %v647_v46  ;;  %2436 = vmatpush1.bf16.msra.mxu0 %v3767_v51  ;;  %v1983_v60 = vmax.f32 %v3285_v11, 0.0  ;;  %v3825_v51 = vld [vmem:[#allocation10] sm:$0xff]  }
 0x24f   : > { %v1986_v58 = vmax.f32 %v3286_v54, 0.0  ;;  %2437 = vmatprep.subr.bf16.mxu0 %v3772_v53  ;;  %v3829_v11 = vld [vmem:[#allocation10 + $0x20] sm:$0xff]   ;;  %v3831_v53 = vld [vmem:[#allocation10 + $0x30] sm:$0xff]   ;;  %v3832_v54 = vld [vmem:[#allocation10 + $0x38] sm:$0xff]  }
 0x250   : > { %v1987_v61 = vmax.f32 %v3287_v56, 0.0  ;;  %v3184_v56 = vld [vmem:[%s4469_s6] ss:$0 sm:$0xff] }
 0x251   : > { %v1990_v63 = vpack.c.bf16 %v1986_v58, %v1982_v57 }
 0x252   : > { %v1991_v1 = vpack.c.bf16 %v1987_v61, %v1983_v60  ;;  %2438 = vmatpush1.bf16.msra.mxu0 %v3770_v59 }
 0x253   : > { %2439 = vmatprep.subr.bf16.mxu0 %v3775_v62 }
 0x254   : > { %2463 = vmatprep.mubr.bf16.mxu0 %v1991_v1 }
 0x256   : > { %2440 = vmatpush1.bf16.msra.mxu0 %v3773_v2 }
 0x257   : > { %2441 = vmatprep.subr.bf16.mxu0 %v3778_v3 }
 0x25a   : > { %2442 = vmatpush1.bf16.msra.mxu0 %v3776_v4  ;;  %v3201_v4 = vld [vmem:[%s4471_s8] ss:$0 sm:$0xff] }
 0x25b   : > { %2443 = vmatprep.subr.bf16.mxu0 %v3781_v5 }
 0x25e   : > { %2444 = vmatpush1.bf16.msra.mxu0 %v3779_v6 }
 0x25f   : > { %2445 = vmatprep.subr.bf16.mxu0 %v3784_v7 }
 0x262   : > { %2446 = vmatpush1.bf16.msra.mxu0 %v3782_v8 }
 0x263   : > { %2447 = vmatprep.subr.bf16.mxu0 %v3787_v9 }
 0x266   : > { %2448 = vmatpush1.bf16.msra.mxu0 %v3785_v10 }
 0x267   : > { %2449 = vmatprep.subr.bf16.mxu0 %v3790_v12 }
 0x26a   : > { %2450 = vmatpush1.bf16.msra.mxu0 %v3788_v13 }
 0x26b   : > { %2451 = vmatprep.subr.bf16.mxu0 %v3793_v14 }
 0x26e   : > { %2452 = vmatpush1.bf16.msra.mxu0 %v3791_v15 }
 0x26f   : > { %2453 = vmatprep.subr.bf16.mxu0 %v3796_v16 }
 0x272   : > { %2454 = vmatpush1.bf16.msra.mxu0 %v3794_v19 }
 0x273   : > { %2455 = vmatprep.subr.bf16.mxu0 %v3799_v21 }
 0x276   : > { %2456 = vmatpush1.bf16.msra.mxu0 %v3797_v22 }
 0x277   : > { %2457 = vmatprep.subr.bf16.mxu0 %v3802_v23 }
 0x27a   : > { %2458 = vmatpush1.bf16.msra.mxu0 %v3800_v24 }
 0x27b   : > { %2459 = vmatprep.subr.bf16.mxu0 %v3805_v25 }
 0x27e   : > { %2460 = vmatpush1.bf16.msra.mxu0 %v3803_v26 }
 0x27f   : > { %2461 = vmatprep.subr.bf16.mxu0 %v3808_v27 }
 0x282   : > { %2462 = vmatpush1.bf16.msra.mxu0 %v3806_v28 }
 0x285   : > { %2464 = vmatmul.mubr.bf16.vlgmr.msra.gmra.mrb[4].mxu0 %v1990_v63 }
 0x358   : > { %v2465_v38 = vpop.f32.mrb[4].mxu0 }
 0x359   : > { %v3288_v39 = vadd.f32 %v2465_v38, %v2061_v36  ;;  %v2467_v40 = vpop.f32.mrb[5].mxu0 }
 0x35a   : > { %v3289_v41 = vadd.f32 %v2467_v40, %v2065_v37  ;;  %v2469_v42 = vpop.f32.mrb[6].mxu0 }
 0x35b   : > { %v3290_v43 = vadd.f32 %v2469_v42, %v2061_v36  ;;  %v2471_v44 = vpop.f32.mrb[7].mxu0  ;;  %v2474_v0 = vmax.f32 %v3288_v39, 0.0 }
 0x35c   : > { %v3291_v45 = vadd.f32 %v2471_v44, %v2065_v37  ;;  %v2475_v47 = vmax.f32 %v3289_v41, 0.0 }
 0x35d   : > { %v2476_v46 = vmax.f32 %v3290_v43, 0.0 }
 0x35e   : > { %v2477_v48 = vmax.f32 %v3291_v45, 0.0 }
 0x35f   : > { %v2478_v49 = vpack.c.bf16 %v2476_v46, %v2474_v0 }
 0x360   : > { %v2479_v50 = vpack.c.bf16 %v2477_v48, %v2475_v47 }
 0x362   : > { %2647 = vmatprep.mubr.bf16.mxu1 %v2479_v50 }
 0x363   : > { %2648 = vmatmul.mubr.bf16.vlgmr.msra.gmra.mrb[8].mxu1 %v2478_v49 }
 0x364   : > { %3257 = vmatpush3.bf16.msra.mxu1 %v3825_v51  ;;  %3272 = vmatprep.mubr.msk.bf16.mxu1 %vm4066_vm1, %v4065_v34 }
 0x365   : > { %3258 = vmatprep.subr.bf16.mxu1 %v4065_v34 }
 0x368   : > { %3259 = vmatpush3.bf16.msra.mxu1 %v3826_v17 }
 0x369   : > { %3260 = vmatprep.subr.bf16.mxu1 %v4065_v34 }
 0x36c   : > { %3261 = vmatpush3.bf16.msra.mxu1 %v3827_v18 }
 0x36d   : > { %3262 = vmatprep.subr.bf16.mxu1 %v4065_v34 }
 0x370   : > { %3263 = vmatpush3.bf16.msra.mxu1 %v3828_v20 }
 0x371   : > { %3264 = vmatprep.subr.bf16.mxu1 %v4065_v34 }
 0x374   : > { %3265 = vmatpush3.bf16.msra.mxu1 %v3829_v11 }
 0x375   : > { %3266 = vmatprep.subr.bf16.mxu1 %v4065_v34 }
 0x378   : > { %3267 = vmatpush3.bf16.msra.mxu1 %v3830_v52 }
 0x379   : > { %3268 = vmatprep.subr.bf16.mxu1 %v4065_v34 }
 0x37c   : > { %3269 = vmatpush3.bf16.msra.mxu1 %v3831_v53 }
 0x37d   : > { %3270 = vmatprep.subr.bf16.mxu1 %v4065_v34 }
 0x380   : > { %3271 = vmatpush3.bf16.msra.mxu1 %v3832_v54 }
 0x436   : > { %v3241_v55 = vpop.f32.mrb[8].mxu1 }
 0x437   : > { %v3242_v57 = vpop.f32.mrb[9].mxu1 }
 0x438   : > { %v3243_v58 = vadd.f32 %v3242_v57, %v3241_v55  ;;  %v3244_v59 = vpop.f32.mrb[10].mxu1 }
 0x439   : > { %v3245_v60 = vpop.f32.mrb[11].mxu1 }
 0x43a   : > { %v2650_v61 = vadd.f32 %v3243_v58, %v3184_v56  ;;  %v3246_v62 = vadd.f32 %v3245_v60, %v3244_v59 }
 0x43c   : > { %v2653_v63 = vadd.f32 %v3246_v62, %v3184_v56  ;;  %v2656_v1 = vmax.f32 %v2650_v61, 0.0 }
 0x43e   : > { %v2657_v2 = vmax.f32 %v2653_v63, 0.0 }
 0x440   : > { %v2658_v3 = vpack.c.bf16 %v2657_v2, %v2656_v1 }
 0x442   : > { %3273 = vmatmul.mubr.bf16.vlgmr.msra.gmra.mrb[12].mxu1 %v2658_v3 }
 0x515   : > { %v2764_v5 = vpop.f32.mrb[12].mxu1 }
 0x516   : > { %v3274_v6 = vpop.f32.mrb[13].mxu1  ;;  %v2765_v8 = vadd.f32 %v3201_v4, %v2764_v5 }
 0x517   : > { %v2767_v7 = vpop.f32.mrb[14].mxu1 }
 0x518   : > { %v2768_v9 = vadd.f32 %v3201_v4, %v2767_v7  ;;  %v3275_v10 = vpop.f32.mrb[15].mxu1 }
 0x51a   : > { %v3223_v12 = vpack.c.bf16 %v2768_v9, %v2765_v8 }
 0x51c   : > { %3224 = vst [vmem:[%s409_s30] sm:$0xff] %v3223_v12  }
 0x51d   : > { %3988 = shalt.err (!%p3985_p13)
}
 0x51e   : > { %s3989_s16 = scalar_lea.hbm %s4419_s15, 128  ;;  %s3993_s20 = scalar_lea.hbm %s4472_s9, 256 }
 0x51f   : > { %p3990_p9 = scmp.ne.s32.totalorder %s4419_s15, %s3989_s16  ;;  %p3994_p4 = scmp.lt.u32.totalorder %s4419_s15, %s4472_s9 }
 0x520   : > { %p3995_p8 = scmp.lt.u32.totalorder %s3993_s20, %s3989_s16  ;;  %p3997_p3 = scmp.lt.u32.totalorder %s3989_s16, %s4419_s15 }
 0x521   : > { %p3991_p0 = pnand %p3990_p9, %p4282_p10 }
 0x522   : > { %p3996_p6 = por %p3995_p8, %p3994_p4 }
 0x523   : > { %p3992_p11 = pneg %p3991_p0 }
 0x524   : > { %p3998_p5 = por %p3997_p3, %p3996_p6 }
 0x526   : > { %p3999_p7 = pnand %p3998_p5, %p3992_p11 }
 0x528   : > { %4002 = shalt.err (!%p3999_p7)
}
 0x529   : > { %s4068_s22 = smov 64   ;;  %s4069_s29 = smov 4  }
 0x52a   : > { %3337 = dma.vmem_to_hbm [thread:$0]  (%p4282_p10), %s4414_s1, 128, %s4419_s15, %s2782_s17, %s4068_s22, %s4068_s22, %s4069_s29  }
 0x52b PF: > { %s4500_s18 = sld [smem:[#allocation16_spill]]  ;;  %s4501_s13 = sld [smem:[#allocation17_spill]] }
 0x52c   : > { %p4503_p2 = scmp.ge.s32.totalorder %s4049_s12, 2 }
 0x531   : > { %s2810_s25 = sand.u32 1, %s4500_s18   ;;  %p4502_p12 = scmp.ne.s32.totalorder %s4501_s13, 0 }
 0x532   : > { %s2811_s23 = scalar_lea.sflag [#allocation4], %s2810_s25 }
 0x533   : > { %p3357_p1 = pnand %p4503_p2, %p4502_p12 }
 0x535   : > { %4032 = dma.done.wait (!%p3357_p1), %s2811_s23, 128  }
 0x536   : > { %4034 = vsyncadd (!%p3357_p1), %s2811_s23, 4294967168  ;;  %p24_p13 = scmp.ge.s32.totalorder %s4272_s28, 4   ;;  %s4504_s30 = smov %s4041_s10 }
 0x537   : > { %s4505_s10 = smov %s4045_s11  ;;  %s4506_s11 = smov %s4288_s26 }
 0x538   : > { %s4507_s12 = smov %s4272_s28  ;;  %26 = sbr.rel (!%p24_p13) target bundleno = 9 (0x9), region = 117 }
 0x53f   :  { %2816 = vsyncpa [#allocation3], 1 }
 0x540   :  { %2818 = vsyncpa [#allocation3 + $0x1], 1 }
 0x541   :  { %2819 = vsyncpa [#allocation6], 1 }
 0x542   :  { %2820 = vsyncpa [#allocation9], 1 }
 0x543   :  { %2821 = vsyncpa [#allocation4], 1 }
 0x544   :  { %2823 = vsyncpa [#allocation4 + $0x1], 1 }

</bundles_post_ra>
